<compile_context>
chip_gen: v5e
topology: v5e:2x2
jax: 0.10.0
libtpu: 0.0.40
codegen_flags: <defaults>
</compile_context>

<pallas_src>
import math
from functools import partial

import jax
import jax.numpy as jnp
from jax.experimental import pallas as pl
from jax.experimental.pallas import tpu as pltpu

LN_EPS = 1e-12                      # HuggingFace BERT LayerNorm eps
_GELU_C = 0.7978845608028654        # sqrt(2/pi)


# ------------------------------ small helpers -------------------------------

def _tile(dim, target, align):
    """Largest divisor of `dim` that is <= target and a multiple of `align`
    (falls back to the full dim, which is always layout-legal)."""
    if dim <= target:
        return dim
    for d in range(target, 0, -1):
        if dim % d == 0 and d % align == 0:
            return d
    return dim


def _dtype_bytes(dt):
    return 2 if dt in (jnp.bfloat16, jnp.float16) else 4


def _vmem_limit(block_bytes, scratch_bytes=0):
    """Explicit scoped-VMEM limit: double-buffered pipeline blocks + scratch +
    headroom, capped so the limit is always legal on v7x's 64 MiB VMEM."""
    need = 2 * sum(block_bytes) + scratch_bytes
    return int(min(max(need + (4 << 20), 32 << 20), 56 << 20))


def _gelu(x):
    # TODO(synk): tanh-GELU approximation (|err| ~1e-3 vs HF BERT's exact
    # erf-GELU); chosen so the epilogue is one EUP tanh + a few VALU ops.
    return 0.5 * x * (1.0 + jnp.tanh(_GELU_C * (x + 0.044715 * x * x * x)))


def _ln_core(x, g, b):
    mean = jnp.mean(x, axis=-1, keepdims=True)
    var = jnp.mean((x - mean) ** 2, axis=-1, keepdims=True)
    return (x - mean) * jax.lax.rsqrt(var + LN_EPS) * g + b


def _to_bf16(x):
    return x if x.dtype == jnp.bfloat16 else x.astype(jnp.bfloat16)


# ----------------------------- Pallas kernels ------------------------------

def _linear_kernel(x_ref, w_ref, b_ref, o_ref, acc_ref, *, nk, activation):
    """Tiled matmul: grid (nm, nn, nk); f32 VMEM accumulator; bias (+GELU)
    fused into the k==last epilogue."""
    k = pl.program_id(2)

    @pl.when(k == 0)
    def _():
        acc_ref[...] = jnp.zeros_like(acc_ref)

    acc_ref[...] += jnp.dot(x_ref[...], w_ref[...],
                            preferred_element_type=jnp.float32)

    @pl.when(k == nk - 1)
    def _():
        y = acc_ref[...] + b_ref[...].astype(jnp.float32)
        if activation == "gelu":
            y = _gelu(y)
        o_ref[...] = y.astype(o_ref.dtype)


def _make_linear_add_ln_kernel(nk, with_extra):
    """Tiled matmul (grid (nm, nk), full-N block) fused with
    LayerNorm(x @ w + b + residual) [+ extra] in the k==last epilogue."""
    def kernel(*refs):
        if with_extra:
            (x_ref, w_ref, b_ref, res_ref, extra_ref,
             g_ref, beta_ref, o_ref, acc_ref) = refs
        else:
            (x_ref, w_ref, b_ref, res_ref,
             g_ref, beta_ref, o_ref, acc_ref) = refs
            extra_ref = None

        k = pl.program_id(1)

        @pl.when(k == 0)
        def _():
            acc_ref[...] = jnp.zeros_like(acc_ref)

        acc_ref[...] += jnp.dot(x_ref[...], w_ref[...],
                                preferred_element_type=jnp.float32)

        @pl.when(k == nk - 1)
        def _():
            y = (acc_ref[...] + b_ref[...].astype(jnp.float32)
                 + res_ref[...].astype(jnp.float32))
            y = _ln_core(y, g_ref[...].astype(jnp.float32),
                         beta_ref[...].astype(jnp.float32))
            if with_extra:
                y = y + extra_ref[...].astype(jnp.float32)
            o_ref[...] = y.astype(o_ref.dtype)

    return kernel


def _layernorm_kernel(x_ref, g_ref, b_ref, o_ref):
    x = x_ref[...].astype(jnp.float32)
    o_ref[...] = _ln_core(x, g_ref[...].astype(jnp.float32),
                          b_ref[...].astype(jnp.float32)).astype(o_ref.dtype)


def _make_attention_kernel(heads_per_block, head_dim):
    """One (batch, head-group, q-tile) step: softmax(q k^T) v per head.
    Per-head contexts are concatenated in-register and stored once as a
    lane-dense (tq, hg*Dh) slab (no 64-lane masked stores).  The 1/sqrt(Dh)
    scale is folded into the Q projection weights."""
    def kernel(q_ref, k_ref, v_ref, o_ref):
        ctxs = []
        for g in range(heads_per_block):           # static unroll, small
            lo = g * head_dim
            hi = lo + head_dim
            q = q_ref[0, :, lo:hi]                  # (tq, Dh) bf16
            k = k_ref[0, :, lo:hi]                  # (S,  Dh) bf16
            v = v_ref[0, :, lo:hi]                  # (S,  Dh) bf16
            # scores = q @ k^T (contract head_dim); f32 accumulation on MXU.
            s = jax.lax.dot_general(q, k, (((1,), (1,)), ((), ())),
                                    preferred_element_type=jnp.float32)
            m = jnp.max(s, axis=-1, keepdims=True)
            p = jnp.exp(s - m)
            denom = jnp.sum(p, axis=-1, keepdims=True)
            ctx = jnp.dot(p.astype(v.dtype), v,
                          preferred_element_type=jnp.float32)
            ctx = ctx * pl.reciprocal(denom, approx=True)   # EUP, post-PV
            ctxs.append(ctx)
        # Single lane-dense store of the whole head-group slab.
        o_ref[0] = jnp.concatenate(ctxs, axis=-1).astype(o_ref.dtype)
    return kernel


# ------------------------------ Pallas wrappers -----------------------------

def linear(x, w, b, activation=None, out_dtype=jnp.bfloat16):
    """(B, S, K) @ (K, N) + (N,) -> (B, S, N); bf16 MXU inputs, f32 acc."""
    B, S, K = x.shape
    N = w.shape[1]
    M = B * S
    xb = _to_bf16(x.reshape(M, K))
    wb = _to_bf16(w)

    tm = _tile(M, 512, 16)          # bf16-native sublane packing (16, 128)
    tn = _tile(N, 512, 128)
    tk = _tile(K, 1024, 128)        # full K up to 1024
    nm, nn, nk = M // tm, N // tn, K // tk

    vmem = _vmem_limit(
        [tm * tk * 2, tk * tn * 2, tn * 4, tm * tn * _dtype_bytes(out_dtype)],
        scratch_bytes=tm * tn * 4)

    out = pl.pallas_call(
        partial(_linear_kernel, nk=nk, activation=activation),
        grid=(nm, nn, nk),
        in_specs=[pl.BlockSpec((tm, tk), lambda i, j, k: (i, k)),
                  pl.BlockSpec((tk, tn), lambda i, j, k: (k, j)),
                  pl.BlockSpec((1, tn), lambda i, j, k: (0, j))],
        out_specs=pl.BlockSpec((tm, tn), lambda i, j, k: (i, j)),
        out_shape=jax.ShapeDtypeStruct((M, N), out_dtype),
        scratch_shapes=[pltpu.VMEM((tm, tn), jnp.float32)],
        compiler_params=pltpu.CompilerParams(
            dimension_semantics=("parallel", "parallel", "arbitrary"),
            vmem_limit_bytes=vmem),
    )(xb, wb, b.reshape(1, N))
    return out.reshape(B, S, N)


def linear_add_layernorm(x, w, b, residual, gamma, beta, extra=None,
                         out_dtype=jnp.bfloat16):
    """LayerNorm(x @ w + b + residual) [+ extra] — the BERT post-attention /
    post-FFN pattern, fused into the matmul epilogue (full-N blocks so the
    LayerNorm reduction sees the whole feature dim)."""
    B, S, K = x.shape
    N = w.shape[1]
    M = B * S
    xb = _to_bf16(x.reshape(M, K))
    wb = _to_bf16(w)
    res = _to_bf16(residual.reshape(M, N))

    tm = _tile(M, 512, 16)
    tk = _tile(K, 1024, 128)
    nm, nk = M // tm, K // tk

    in_specs = [pl.BlockSpec((tm, tk), lambda i, k: (i, k)),
                pl.BlockSpec((tk, N), lambda i, k: (k, 0)),
                pl.BlockSpec((1, N), lambda i, k: (0, 0)),
                pl.BlockSpec((tm, N), lambda i, k: (i, 0))]
    args = [xb, wb, b.reshape(1, N), res]
    blk_bytes = [tm * tk * 2, tk * N * 2, N * 4, tm * N * 2]
    if extra is not None:
        in_specs.append(pl.BlockSpec((tm, N), lambda i, k: (i, 0)))
        args.append(_to_bf16(extra.reshape(M, N)))
        blk_bytes.append(tm * N * 2)
    in_specs += [pl.BlockSpec((1, N), lambda i, k: (0, 0)),
                 pl.BlockSpec((1, N), lambda i, k: (0, 0))]
    args += [gamma.reshape(1, N), beta.reshape(1, N)]
    blk_bytes += [N * 4, N * 4, tm * N * _dtype_bytes(out_dtype)]

    vmem = _vmem_limit(blk_bytes, scratch_bytes=tm * N * 4)

    out = pl.pallas_call(
        _make_linear_add_ln_kernel(nk, extra is not None),
        grid=(nm, nk),
        in_specs=in_specs,
        out_specs=pl.BlockSpec((tm, N), lambda i, k: (i, 0)),
        out_shape=jax.ShapeDtypeStruct((M, N), out_dtype),
        scratch_shapes=[pltpu.VMEM((tm, N), jnp.float32)],
        compiler_params=pltpu.CompilerParams(
            dimension_semantics=("parallel", "arbitrary"),
            vmem_limit_bytes=vmem),
    )(*args)
    return out.reshape(B, S, N)


def layernorm(x, gamma, beta, out_dtype=jnp.bfloat16):
    """Row-tiled LayerNorm (used for the embedding output)."""
    B, S, H = x.shape
    M = B * S
    tm = _tile(M, 512, 16)
    nm = M // tm
    out = pl.pallas_call(
        _layernorm_kernel,
        grid=(nm,),
        in_specs=[pl.BlockSpec((tm, H), lambda i: (i, 0)),
                  pl.BlockSpec((1, H), lambda i: (0, 0)),
                  pl.BlockSpec((1, H), lambda i: (0, 0))],
        out_specs=pl.BlockSpec((tm, H), lambda i: (i, 0)),
        out_shape=jax.ShapeDtypeStruct((M, H), out_dtype),
        compiler_params=pltpu.CompilerParams(dimension_semantics=("parallel",)),
    )(x.reshape(M, H), gamma.reshape(1, H), beta.reshape(1, H))
    return out.reshape(B, S, H)


def _heads_per_block(num_heads, head_dim):
    """Largest head-group whose lane width is a multiple of 128 (<= 256);
    otherwise take all heads (block == full H, always layout-legal)."""
    for hg in range(num_heads, 0, -1):
        if num_heads % hg == 0:
            w = hg * head_dim
            if w <= 256 and w % 128 == 0:
                return hg
    return num_heads


def multi_head_attention_from_qkv(qkv, num_heads):
    """qkv: (B, S, 3H) bf16 from the fused QKV projection -> context (B, S, H).

    Grid = (batch, head-group, query-tile); each step reads its Q/K/V column
    blocks straight from the fused slab and writes a lane-dense context block.
    """
    B, S, H3 = qkv.shape
    H = H3 // 3
    Dh = H // num_heads
    hg = _heads_per_block(num_heads, Dh)
    ng = num_heads // hg
    blk = hg * Dh
    tq = _tile(S, 256, 16)          # query-row tiling (flash-lite)
    nq = S // tq

    if blk % 128 == 0:
        # Read Q/K/V head-groups straight out of the fused (B, S, 3H) tensor.
        qs = pl.BlockSpec((1, tq, blk), lambda b, g, qi: (b, qi, g))
        ks = pl.BlockSpec((1, S, blk), lambda b, g, qi: (b, 0, ng + g))
        vs = pl.BlockSpec((1, S, blk), lambda b, g, qi: (b, 0, 2 * ng + g))
        args = (qkv, qkv, qkv)
    else:
        # Small/odd H (toy config): slice q/k/v so the block covers the full
        # last dim, satisfying the (8,128) layout rule.
        q, k, v = qkv[..., :H], qkv[..., H:2 * H], qkv[..., 2 * H:]
        qs = pl.BlockSpec((1, tq, blk), lambda b, g, qi: (b, qi, g))
        kvs = pl.BlockSpec((1, S, blk), lambda b, g, qi: (b, 0, g))
        ks = vs = kvs
        args = (q, k, v)

    # TODO(synk): for very long sequences (S >= 2k) the (tq, S) f32 score
    # intermediates should be replaced by full flash-style online-softmax
    # KV tiling (most relevant on v7x's 64 MiB VMEM).
    out = pl.pallas_call(
        _make_attention_kernel(hg, Dh),
        grid=(B, ng, nq),
        in_specs=[qs, ks, vs],
        out_specs=pl.BlockSpec((1, tq, blk), lambda b, g, qi: (b, qi, g)),
        out_shape=jax.ShapeDtypeStruct((B, S, H), jnp.bfloat16),
        compiler_params=pltpu.CompilerParams(
            dimension_semantics=("parallel", "parallel", "parallel")),
    )(*args)
    return out


# ------------------------------ BERT forward --------------------------------

def init_bert_params(key, cfg):
    H, I = cfg["hidden"], cfg["intermediate"]
    nH = cfg["num_heads"]
    keys = jax.random.split(key, 3 + cfg["num_layers"])

    def dense(k, shape):
        # Weights stored (in, out); PyTorch stores (out, in) and transposes in
        # forward — synthetic init, so orientation is our choice.
        return jax.random.normal(k, shape, jnp.float32) * 0.02

    params = {
        "word_emb": dense(keys[0], (cfg["vocab_size"], H)),
        "pos_emb": dense(keys[1], (cfg["max_pos"], H)),
        "type_emb": dense(keys[2], (cfg["type_vocab"], H)),
        "emb_ln_g": jnp.ones((H,), jnp.float32),
        "emb_ln_b": jnp.zeros((H,), jnp.float32),
        "layers": [],
    }
    scale = 1.0 / math.sqrt(H // nH)
    for li in range(cfg["num_layers"]):
        lk = jax.random.split(keys[3 + li], 6)
        q_w, k_w, v_w = dense(lk[0], (H, H)), dense(lk[1], (H, H)), dense(lk[2], (H, H))
        # Fused QKV projection; the attention 1/sqrt(Dh) scale is folded into
        # the Q weights (when loading a real checkpoint, scale the Q bias too).
        qkv_w = jnp.concatenate([q_w * scale, k_w, v_w], axis=1)
        qkv_b = jnp.zeros((3 * H,), jnp.float32)
        params["layers"].append({
            # Matmul weights stored bf16 (MXU-native); biases / LN params f32.
            "qkv_w": qkv_w.astype(jnp.bfloat16), "qkv_b": qkv_b,
            "ao_w": dense(lk[3], (H, H)).astype(jnp.bfloat16),
            "ao_b": jnp.zeros((H,), jnp.float32),
            "attn_ln_g": jnp.ones((H,), jnp.float32),
            "attn_ln_b": jnp.zeros((H,), jnp.float32),
            "i_w": dense(lk[4], (H, I)).astype(jnp.bfloat16),
            "i_b": jnp.zeros((I,), jnp.float32),
            "o_w": dense(lk[5], (I, H)).astype(jnp.bfloat16),
            "o_b": jnp.zeros((H,), jnp.float32),
            "ffn_ln_g": jnp.ones((H,), jnp.float32),
            "ffn_ln_b": jnp.zeros((H,), jnp.float32),
        })
    return params


def bert_embeddings(params, input_ids):
    B, S = input_ids.shape
    we = params["word_emb"][input_ids]                 # (B, S, H) gather (glue)
    pe = params["pos_emb"][jnp.arange(S)]              # (S, H)
    te = params["type_emb"][0]                         # (H,)  token_type_ids=0
    emb = we + pe[None, :, :] + te[None, None, :]
    # bf16 out: all inter-layer activations stay bf16 until the final layer.
    return layernorm(emb, params["emb_ln_g"], params["emb_ln_b"],
                     out_dtype=jnp.bfloat16)


def bert_layer(cfg, p, h, fuse_input_add=False, final_layer=False):
    """One BERT encoder layer.  If fuse_input_add, the layer's own input is
    added to its output inside the final fused matmul+LN epilogue (this
    implements the module's hidden_states[-1] + hidden_states[-2] for free)."""
    nH = cfg["num_heads"]

    # Fused QKV projection -> (B, S, 3H) bf16 (feeds the MXU directly).
    qkv = linear(h, p["qkv_w"], p["qkv_b"], out_dtype=jnp.bfloat16)
    ctx = multi_head_attention_from_qkv(qkv, nH)       # (B, S, H) bf16

    # Attention output projection fused with residual-add + LayerNorm.
    h1 = linear_add_layernorm(ctx, p["ao_w"], p["ao_b"], h,
                              p["attn_ln_g"], p["attn_ln_b"],
                              out_dtype=jnp.bfloat16)

    # FFN: intermediate GELU matmul, then output matmul fused with add + LN
    # (+ the final hidden[-1]+hidden[-2] add on the last layer).
    inter = linear(h1, p["i_w"], p["i_b"], activation="gelu",
                   out_dtype=jnp.bfloat16)
    h2 = linear_add_layernorm(inter, p["o_w"], p["o_b"], h1,
                              p["ffn_ln_g"], p["ffn_ln_b"],
                              extra=h if fuse_input_add else None,
                              out_dtype=jnp.float32 if final_layer
                              else jnp.bfloat16)
    return h2


def bert_mid_layer_forward(cfg, params, input_ids):
    # TODO(synk): no attention mask is applied (module is called without one);
    # padded batches would need an additive mask in the attention kernel.
    h = bert_embeddings(params, input_ids)
    n_layers = len(params["layers"])
    for li, lp in enumerate(params["layers"]):
        last = li == n_layers - 1
        # hidden_states[-2] is the input to the last layer; its add into
        # hidden_states[-1] is fused into that layer's final epilogue.
        h = bert_layer(cfg, lp, h, fuse_input_add=last, final_layer=last)
    return h


# ---------------------------------- main -------------------------------------

if __name__ == "__main__":
    cfg = dict(vocab_size=100, hidden=32, num_layers=2, num_heads=4,
               intermediate=64, max_pos=16, type_vocab=2)

    key = jax.random.PRNGKey(0)
    pkey, ikey = jax.random.split(key)
    params = init_bert_params(pkey, cfg)

    B, S = 2, 8
    input_ids = jax.random.randint(ikey, (B, S), 0, cfg["vocab_size"],
                                   dtype=jnp.int32)

    fwd = jax.jit(partial(bert_mid_layer_forward, cfg))
    out = fwd(params, input_ids)
    out = jax.block_until_ready(out)

    assert out.shape == (B, S, cfg["hidden"]), out.shape
    assert out.dtype == jnp.float32
    assert bool(jnp.all(jnp.isfinite(out)))
    print("KERNEL_OK")
</pallas_src>

<mosaic_0001>
module attributes {stable_mosaic.version = 11 : i64} {
  func.func @_layernorm_kernel(%arg0: i32, %arg1: memref<16x32xf32, #tpu.memory_space<vmem>>, %arg2: memref<1x32xf32, #tpu.memory_space<vmem>>, %arg3: memref<1x32xf32, #tpu.memory_space<vmem>>, %arg4: memref<16x32xbf16, #tpu.memory_space<vmem>>) attributes {dimension_semantics = [#tpu.dimension_semantics<parallel>], iteration_bounds = array<i64: 1>, scalar_prefetch = 0 : i64, scratch_operands = 0 : i64, tpu.core_type = #tpu.core_type<tc>, window_params = [{transform_indices = @transform_0, window_bounds = array<i64: 16, 32>}, {pipeline_mode = #tpu.pipeline_mode<synchronous>, transform_indices = @transform_1, window_bounds = array<i64: 1, 32>}, {pipeline_mode = #tpu.pipeline_mode<synchronous>, transform_indices = @transform_2, window_bounds = array<i64: 1, 32>}, {transform_indices = @transform_3, window_bounds = array<i64: 16, 32>}]} {
    %c0 = arith.constant 0 : index
    %c0_0 = arith.constant 0 : index
    %0 = vector.load %arg1[%c0, %c0_0] : memref<16x32xf32, #tpu.memory_space<vmem>>, vector<16x32xf32>
    %c0_1 = arith.constant 0 : index
    %c0_2 = arith.constant 0 : index
    %1 = vector.load %arg2[%c0_1, %c0_2] : memref<1x32xf32, #tpu.memory_space<vmem>>, vector<1x32xf32>
    %c0_3 = arith.constant 0 : index
    %c0_4 = arith.constant 0 : index
    %2 = vector.load %arg3[%c0_3, %c0_4] : memref<1x32xf32, #tpu.memory_space<vmem>>, vector<1x32xf32>
    %cst = arith.constant dense<0.000000e+00> : vector<16xf32>
    %3 = vector.multi_reduction <add>, %0, %cst [1] : vector<16x32xf32> to vector<16xf32>
    %4 = vector.shape_cast %3 : vector<16xf32> to vector<16x1xf32>
    %cst_5 = arith.constant 3.200000e+01 : f32
    %5 = vector.broadcast %cst_5 : f32 to vector<16x1xf32>
    %6 = arith.divf %4, %5 : vector<16x1xf32>
    %7 = vector.broadcast %6 : vector<16x1xf32> to vector<16x32xf32>
    %8 = arith.subf %0, %7 : vector<16x32xf32>
    %9 = arith.mulf %8, %8 : vector<16x32xf32>
    %cst_6 = arith.constant dense<0.000000e+00> : vector<16xf32>
    %10 = vector.multi_reduction <add>, %9, %cst_6 [1] : vector<16x32xf32> to vector<16xf32>
    %11 = vector.shape_cast %10 : vector<16xf32> to vector<16x1xf32>
    %cst_7 = arith.constant 3.200000e+01 : f32
    %12 = vector.broadcast %cst_7 : f32 to vector<16x1xf32>
    %13 = arith.divf %11, %12 : vector<16x1xf32>
    %14 = vector.broadcast %6 : vector<16x1xf32> to vector<16x32xf32>
    %15 = arith.subf %0, %14 : vector<16x32xf32>
    %cst_8 = arith.constant 9.99999996E-13 : f32
    %16 = vector.broadcast %cst_8 : f32 to vector<16x1xf32>
    %17 = arith.addf %13, %16 : vector<16x1xf32>
    %18 = math.rsqrt %17 : vector<16x1xf32>
    %19 = vector.broadcast %18 : vector<16x1xf32> to vector<16x32xf32>
    %20 = arith.mulf %15, %19 : vector<16x32xf32>
    %21 = vector.broadcast %1 : vector<1x32xf32> to vector<16x32xf32>
    %22 = arith.mulf %20, %21 : vector<16x32xf32>
    %23 = vector.broadcast %2 : vector<1x32xf32> to vector<16x32xf32>
    %24 = arith.addf %22, %23 : vector<16x32xf32>
    %25 = arith.truncf %24 : vector<16x32xf32> to vector<16x32xbf16>
    %c0_9 = arith.constant 0 : index
    %c0_10 = arith.constant 0 : index
    %26 = vector.load %arg4[%c0_9, %c0_10] : memref<16x32xbf16, #tpu.memory_space<vmem>>, vector<16x32xbf16>
    tpu.vector_store %arg4[%c0_9, %c0_10], %25 {strides = array<i32>} : memref<16x32xbf16, #tpu.memory_space<vmem>>, vector<16x32xbf16>,
    return
  }
  func.func @transform_0(%arg0: i32) -> (i32, i32) {
    %c0_i32 = arith.constant 0 : i32
    %c0_i32_0 = arith.constant 0 : i32
    return %arg0, %c0_i32 : i32, i32
  }
  func.func @transform_1(%arg0: i32) -> (i32, i32) {
    %c0_i32 = arith.constant 0 : i32
    %c0_i32_0 = arith.constant 0 : i32
    %c0_i32_1 = arith.constant 0 : i32
    return %c0_i32, %c0_i32_0 : i32, i32
  }
  func.func @transform_2(%arg0: i32) -> (i32, i32) {
    %c0_i32 = arith.constant 0 : i32
    %c0_i32_0 = arith.constant 0 : i32
    %c0_i32_1 = arith.constant 0 : i32
    return %c0_i32, %c0_i32_0 : i32, i32
  }
  func.func @transform_3(%arg0: i32) -> (i32, i32) {
    %c0_i32 = arith.constant 0 : i32
    %c0_i32_0 = arith.constant 0 : i32
    return %arg0, %c0_i32 : i32, i32
  }
}

module attributes {stable_mosaic.version = 11 : i64} {
  func.func @_linear_kernel(%arg0: i32, %arg1: i32, %arg2: i32, %arg3: memref<16x32xbf16, #tpu.memory_space<vmem>>, %arg4: memref<32x96xbf16, #tpu.memory_space<vmem>>, %arg5: memref<1x96xf32, #tpu.memory_space<vmem>>, %arg6: memref<16x96xbf16, #tpu.memory_space<vmem>>, %arg7: memref<16x96xf32, #tpu.memory_space<vmem>>) attributes {dimension_semantics = [#tpu.dimension_semantics<parallel>, #tpu.dimension_semantics<parallel>, #tpu.dimension_semantics<arbitrary>], iteration_bounds = array<i64: 1, 1, 1>, scalar_prefetch = 0 : i64, scratch_operands = 1 : i64, tpu.core_type = #tpu.core_type<tc>, window_params = [{transform_indices = @transform_0, window_bounds = array<i64: 16, 32>}, {transform_indices = @transform_1, window_bounds = array<i64: 32, 96>}, {transform_indices = @transform_2, window_bounds = array<i64: 1, 96>}, {transform_indices = @transform_3, window_bounds = array<i64: 16, 96>}]} {
    %c0_i32 = arith.constant 0 : i32
    %0 = arith.cmpi eq, %arg2, %c0_i32 : i32
    %1 = arith.extui %0 : i1 to i32
    %c0_i32_0 = arith.constant 0 : i32
    %2 = arith.cmpi ne, %1, %c0_i32_0 : i32
    scf.if %2 {
      %cst_10 = arith.constant 0.000000e+00 : f32
      %12 = vector.broadcast %cst_10 : f32 to vector<16x96xf32>
      %c0_11 = arith.constant 0 : index
      %c0_12 = arith.constant 0 : index
      %13 = vector.load %arg7[%c0_11, %c0_12] : memref<16x96xf32, #tpu.memory_space<vmem>>, vector<16x96xf32>
      tpu.vector_store %arg7[%c0_11, %c0_12], %12 {strides = array<i32>} : memref<16x96xf32, #tpu.memory_space<vmem>>, vector<16x96xf32>,
    } else {
    }
    %c0 = arith.constant 0 : index
    %c0_1 = arith.constant 0 : index
    %3 = vector.load %arg7[%c0, %c0_1] : memref<16x96xf32, #tpu.memory_space<vmem>>, vector<16x96xf32>
    %c0_2 = arith.constant 0 : index
    %c0_3 = arith.constant 0 : index
    %4 = vector.load %arg3[%c0_2, %c0_3] : memref<16x32xbf16, #tpu.memory_space<vmem>>, vector<16x32xbf16>
    %c0_4 = arith.constant 0 : index
    %c0_5 = arith.constant 0 : index
    %5 = vector.load %arg4[%c0_4, %c0_5] : memref<32x96xbf16, #tpu.memory_space<vmem>>, vector<32x96xbf16>
    %cst = arith.constant dense<0.000000e+00> : vector<16x96xf32>
    %6 = tpu.matmul %4, %5, %cst {dimension_numbers = #tpu.dot_dimension_numbers<[1], [0], [0], [1], [0, 0, 1, 1], [], []>} : vector<16x32xbf16>, vector<32x96xbf16>, vector<16x96xf32> -> vector<16x96xf32>
    %7 = arith.addf %3, %6 : vector<16x96xf32>
    %c0_6 = arith.constant 0 : index
    %c0_7 = arith.constant 0 : index
    %8 = vector.load %arg7[%c0_6, %c0_7] : memref<16x96xf32, #tpu.memory_space<vmem>>, vector<16x96xf32>
    tpu.vector_store %arg7[%c0_6, %c0_7], %7 {strides = array<i32>} : memref<16x96xf32, #tpu.memory_space<vmem>>, vector<16x96xf32>,
    %c0_i32_8 = arith.constant 0 : i32
    %9 = arith.cmpi eq, %arg2, %c0_i32_8 : i32
    %10 = arith.extui %9 : i1 to i32
    %c0_i32_9 = arith.constant 0 : i32
    %11 = arith.cmpi ne, %10, %c0_i32_9 : i32
    scf.if %11 {
      %c0_10 = arith.constant 0 : index
      %c0_11 = arith.constant 0 : index
      %12 = vector.load %arg7[%c0_10, %c0_11] : memref<16x96xf32, #tpu.memory_space<vmem>>, vector<16x96xf32>
      %c0_12 = arith.constant 0 : index
      %c0_13 = arith.constant 0 : index
      %13 = vector.load %arg5[%c0_12, %c0_13] : memref<1x96xf32, #tpu.memory_space<vmem>>, vector<1x96xf32>
      %14 = vector.broadcast %13 : vector<1x96xf32> to vector<16x96xf32>
      %15 = arith.addf %12, %14 : vector<16x96xf32>
      %16 = arith.truncf %15 : vector<16x96xf32> to vector<16x96xbf16>
      %c0_14 = arith.constant 0 : index
      %c0_15 = arith.constant 0 : index
      %17 = vector.load %arg6[%c0_14, %c0_15] : memref<16x96xbf16, #tpu.memory_space<vmem>>, vector<16x96xbf16>
      tpu.vector_store %arg6[%c0_14, %c0_15], %16 {strides = array<i32>} : memref<16x96xbf16, #tpu.memory_space<vmem>>, vector<16x96xbf16>,
    } else {
    }
    return
  }
  func.func @transform_0(%arg0: i32, %arg1: i32, %arg2: i32) -> (i32, i32) {
    %c0_i32 = arith.constant 0 : i32
    return %arg0, %arg2 : i32, i32
  }
  func.func @transform_1(%arg0: i32, %arg1: i32, %arg2: i32) -> (i32, i32) {
    %c0_i32 = arith.constant 0 : i32
    return %arg2, %arg1 : i32, i32
  }
  func.func @transform_2(%arg0: i32, %arg1: i32, %arg2: i32) -> (i32, i32) {
    %c0_i32 = arith.constant 0 : i32
    %c0_i32_0 = arith.constant 0 : i32
    return %c0_i32, %arg1 : i32, i32
  }
  func.func @transform_3(%arg0: i32, %arg1: i32, %arg2: i32) -> (i32, i32) {
    %c0_i32 = arith.constant 0 : i32
    return %arg0, %arg1 : i32, i32
  }
}

module attributes {stable_mosaic.version = 11 : i64} {
  func.func @kernel(%arg0: i32, %arg1: i32, %arg2: i32, %arg3: memref<1x8x32xbf16, #tpu.memory_space<vmem>>, %arg4: memref<1x8x32xbf16, #tpu.memory_space<vmem>>, %arg5: memref<1x8x32xbf16, #tpu.memory_space<vmem>>, %arg6: memref<1x8x32xbf16, #tpu.memory_space<vmem>>) attributes {dimension_semantics = [#tpu.dimension_semantics<parallel>, #tpu.dimension_semantics<parallel>, #tpu.dimension_semantics<parallel>], iteration_bounds = array<i64: 2, 1, 1>, scalar_prefetch = 0 : i64, scratch_operands = 0 : i64, tpu.core_type = #tpu.core_type<tc>, window_params = [{transform_indices = @transform_0, window_bounds = array<i64: 1, 8, 32>}, {transform_indices = @transform_1, window_bounds = array<i64: 1, 8, 32>}, {transform_indices = @transform_2, window_bounds = array<i64: 1, 8, 32>}, {transform_indices = @transform_3, window_bounds = array<i64: 1, 8, 32>}]} {
    %c0 = arith.constant 0 : index
    %c0_0 = arith.constant 0 : index
    %c0_1 = arith.constant 0 : index
    %0 = vector.load %arg3[%c0, %c0_0, %c0_1] : memref<1x8x32xbf16, #tpu.memory_space<vmem>>, vector<1x8x8xbf16>
    %1 = vector.shape_cast %0 : vector<1x8x8xbf16> to vector<8x8xbf16>
    %c0_2 = arith.constant 0 : index
    %c0_3 = arith.constant 0 : index
    %c0_4 = arith.constant 0 : index
    %2 = vector.load %arg4[%c0_2, %c0_3, %c0_4] : memref<1x8x32xbf16, #tpu.memory_space<vmem>>, vector<1x8x8xbf16>
    %3 = vector.shape_cast %2 : vector<1x8x8xbf16> to vector<8x8xbf16>
    %c0_5 = arith.constant 0 : index
    %c0_6 = arith.constant 0 : index
    %c0_7 = arith.constant 0 : index
    %4 = vector.load %arg5[%c0_5, %c0_6, %c0_7] : memref<1x8x32xbf16, #tpu.memory_space<vmem>>, vector<1x8x8xbf16>
    %5 = vector.shape_cast %4 : vector<1x8x8xbf16> to vector<8x8xbf16>
    %cst = arith.constant dense<0.000000e+00> : vector<8x8xf32>
    %6 = tpu.matmul %1, %3, %cst {dimension_numbers = #tpu.dot_dimension_numbers<[1], [1], [0], [0], [0, 0, 1, 0], [], []>} : vector<8x8xbf16>, vector<8x8xbf16>, vector<8x8xf32> -> vector<8x8xf32>
    %cst_8 = arith.constant dense<0xFF800000> : vector<8xf32>
    %7 = vector.multi_reduction <maximumf>, %6, %cst_8 [1] : vector<8x8xf32> to vector<8xf32>
    %8 = vector.shape_cast %7 : vector<8xf32> to vector<8x1xf32>
    %9 = vector.broadcast %8 : vector<8x1xf32> to vector<8x8xf32>
    %10 = arith.subf %6, %9 : vector<8x8xf32>
    %11 = math.exp %10 : vector<8x8xf32>
    %cst_9 = arith.constant dense<0.000000e+00> : vector<8xf32>
    %12 = vector.multi_reduction <add>, %11, %cst_9 [1] : vector<8x8xf32> to vector<8xf32>
    %13 = vector.shape_cast %12 : vector<8xf32> to vector<8x1xf32>
    %14 = arith.truncf %11 : vector<8x8xf32> to vector<8x8xbf16>
    %cst_10 = arith.constant dense<0.000000e+00> : vector<8x8xf32>
    %15 = tpu.matmul %14, %5, %cst_10 {dimension_numbers = #tpu.dot_dimension_numbers<[1], [0], [0], [1], [0, 0, 1, 1], [], []>} : vector<8x8xbf16>, vector<8x8xbf16>, vector<8x8xf32> -> vector<8x8xf32>
    %16 = tpu.reciprocal %13 {approx = true} : vector<8x1xf32> -> vector<8x1xf32>
    %17 = vector.broadcast %16 : vector<8x1xf32> to vector<8x8xf32>
    %18 = arith.mulf %15, %17 : vector<8x8xf32>
    %c0_11 = arith.constant 0 : index
    %c0_12 = arith.constant 0 : index
    %c8 = arith.constant 8 : index
    %19 = vector.load %arg3[%c0_11, %c0_12, %c8] : memref<1x8x32xbf16, #tpu.memory_space<vmem>>, vector<1x8x8xbf16>
    %20 = vector.shape_cast %19 : vector<1x8x8xbf16> to vector<8x8xbf16>
    %c0_13 = arith.constant 0 : index
    %c0_14 = arith.constant 0 : index
    %c8_15 = arith.constant 8 : index
    %21 = vector.load %arg4[%c0_13, %c0_14, %c8_15] : memref<1x8x32xbf16, #tpu.memory_space<vmem>>, vector<1x8x8xbf16>
    %22 = vector.shape_cast %21 : vector<1x8x8xbf16> to vector<8x8xbf16>
    %c0_16 = arith.constant 0 : index
    %c0_17 = arith.constant 0 : index
    %c8_18 = arith.constant 8 : index
    %23 = vector.load %arg5[%c0_16, %c0_17, %c8_18] : memref<1x8x32xbf16, #tpu.memory_space<vmem>>, vector<1x8x8xbf16>
    %24 = vector.shape_cast %23 : vector<1x8x8xbf16> to vector<8x8xbf16>
    %cst_19 = arith.constant dense<0.000000e+00> : vector<8x8xf32>
    %25 = tpu.matmul %20, %22, %cst_19 {dimension_numbers = #tpu.dot_dimension_numbers<[1], [1], [0], [0], [0, 0, 1, 0], [], []>} : vector<8x8xbf16>, vector<8x8xbf16>, vector<8x8xf32> -> vector<8x8xf32>
    %cst_20 = arith.constant dense<0xFF800000> : vector<8xf32>
    %26 = vector.multi_reduction <maximumf>, %25, %cst_20 [1] : vector<8x8xf32> to vector<8xf32>
    %27 = vector.shape_cast %26 : vector<8xf32> to vector<8x1xf32>
    %28 = vector.broadcast %27 : vector<8x1xf32> to vector<8x8xf32>
    %29 = arith.subf %25, %28 : vector<8x8xf32>
    %30 = math.exp %29 : vector<8x8xf32>
    %cst_21 = arith.constant dense<0.000000e+00> : vector<8xf32>
    %31 = vector.multi_reduction <add>, %30, %cst_21 [1] : vector<8x8xf32> to vector<8xf32>
    %32 = vector.shape_cast %31 : vector<8xf32> to vector<8x1xf32>
    %33 = arith.truncf %30 : vector<8x8xf32> to vector<8x8xbf16>
    %cst_22 = arith.constant dense<0.000000e+00> : vector<8x8xf32>
    %34 = tpu.matmul %33, %24, %cst_22 {dimension_numbers = #tpu.dot_dimension_numbers<[1], [0], [0], [1], [0, 0, 1, 1], [], []>} : vector<8x8xbf16>, vector<8x8xbf16>, vector<8x8xf32> -> vector<8x8xf32>
    %35 = tpu.reciprocal %32 {approx = true} : vector<8x1xf32> -> vector<8x1xf32>
    %36 = vector.broadcast %35 : vector<8x1xf32> to vector<8x8xf32>
    %37 = arith.mulf %34, %36 : vector<8x8xf32>
    %c0_23 = arith.constant 0 : index
    %c0_24 = arith.constant 0 : index
    %c16 = arith.constant 16 : index
    %38 = vector.load %arg3[%c0_23, %c0_24, %c16] : memref<1x8x32xbf16, #tpu.memory_space<vmem>>, vector<1x8x8xbf16>
    %39 = vector.shape_cast %38 : vector<1x8x8xbf16> to vector<8x8xbf16>
    %c0_25 = arith.constant 0 : index
    %c0_26 = arith.constant 0 : index
    %c16_27 = arith.constant 16 : index
    %40 = vector.load %arg4[%c0_25, %c0_26, %c16_27] : memref<1x8x32xbf16, #tpu.memory_space<vmem>>, vector<1x8x8xbf16>
    %41 = vector.shape_cast %40 : vector<1x8x8xbf16> to vector<8x8xbf16>
    %c0_28 = arith.constant 0 : index
    %c0_29 = arith.constant 0 : index
    %c16_30 = arith.constant 16 : index
    %42 = vector.load %arg5[%c0_28, %c0_29, %c16_30] : memref<1x8x32xbf16, #tpu.memory_space<vmem>>, vector<1x8x8xbf16>
    %43 = vector.shape_cast %42 : vector<1x8x8xbf16> to vector<8x8xbf16>
    %cst_31 = arith.constant dense<0.000000e+00> : vector<8x8xf32>
    %44 = tpu.matmul %39, %41, %cst_31 {dimension_numbers = #tpu.dot_dimension_numbers<[1], [1], [0], [0], [0, 0, 1, 0], [], []>} : vector<8x8xbf16>, vector<8x8xbf16>, vector<8x8xf32> -> vector<8x8xf32>
    %cst_32 = arith.constant dense<0xFF800000> : vector<8xf32>
    %45 = vector.multi_reduction <maximumf>, %44, %cst_32 [1] : vector<8x8xf32> to vector<8xf32>
    %46 = vector.shape_cast %45 : vector<8xf32> to vector<8x1xf32>
    %47 = vector.broadcast %46 : vector<8x1xf32> to vector<8x8xf32>
    %48 = arith.subf %44, %47 : vector<8x8xf32>
    %49 = math.exp %48 : vector<8x8xf32>
    %cst_33 = arith.constant dense<0.000000e+00> : vector<8xf32>
    %50 = vector.multi_reduction <add>, %49, %cst_33 [1] : vector<8x8xf32> to vector<8xf32>
    %51 = vector.shape_cast %50 : vector<8xf32> to vector<8x1xf32>
    %52 = arith.truncf %49 : vector<8x8xf32> to vector<8x8xbf16>
    %cst_34 = arith.constant dense<0.000000e+00> : vector<8x8xf32>
    %53 = tpu.matmul %52, %43, %cst_34 {dimension_numbers = #tpu.dot_dimension_numbers<[1], [0], [0], [1], [0, 0, 1, 1], [], []>} : vector<8x8xbf16>, vector<8x8xbf16>, vector<8x8xf32> -> vector<8x8xf32>
    %54 = tpu.reciprocal %51 {approx = true} : vector<8x1xf32> -> vector<8x1xf32>
    %55 = vector.broadcast %54 : vector<8x1xf32> to vector<8x8xf32>
    %56 = arith.mulf %53, %55 : vector<8x8xf32>
    %c0_35 = arith.constant 0 : index
    %c0_36 = arith.constant 0 : index
    %c24 = arith.constant 24 : index
    %57 = vector.load %arg3[%c0_35, %c0_36, %c24] : memref<1x8x32xbf16, #tpu.memory_space<vmem>>, vector<1x8x8xbf16>
    %58 = vector.shape_cast %57 : vector<1x8x8xbf16> to vector<8x8xbf16>
    %c0_37 = arith.constant 0 : index
    %c0_38 = arith.constant 0 : index
    %c24_39 = arith.constant 24 : index
    %59 = vector.load %arg4[%c0_37, %c0_38, %c24_39] : memref<1x8x32xbf16, #tpu.memory_space<vmem>>, vector<1x8x8xbf16>
    %60 = vector.shape_cast %59 : vector<1x8x8xbf16> to vector<8x8xbf16>
    %c0_40 = arith.constant 0 : index
    %c0_41 = arith.constant 0 : index
    %c24_42 = arith.constant 24 : index
    %61 = vector.load %arg5[%c0_40, %c0_41, %c24_42] : memref<1x8x32xbf16, #tpu.memory_space<vmem>>, vector<1x8x8xbf16>
    %62 = vector.shape_cast %61 : vector<1x8x8xbf16> to vector<8x8xbf16>
    %cst_43 = arith.constant dense<0.000000e+00> : vector<8x8xf32>
    %63 = tpu.matmul %58, %60, %cst_43 {dimension_numbers = #tpu.dot_dimension_numbers<[1], [1], [0], [0], [0, 0, 1, 0], [], []>} : vector<8x8xbf16>, vector<8x8xbf16>, vector<8x8xf32> -> vector<8x8xf32>
    %cst_44 = arith.constant dense<0xFF800000> : vector<8xf32>
    %64 = vector.multi_reduction <maximumf>, %63, %cst_44 [1] : vector<8x8xf32> to vector<8xf32>
    %65 = vector.shape_cast %64 : vector<8xf32> to vector<8x1xf32>
    %66 = vector.broadcast %65 : vector<8x1xf32> to vector<8x8xf32>
    %67 = arith.subf %63, %66 : vector<8x8xf32>
    %68 = math.exp %67 : vector<8x8xf32>
    %cst_45 = arith.constant dense<0.000000e+00> : vector<8xf32>
    %69 = vector.multi_reduction <add>, %68, %cst_45 [1] : vector<8x8xf32> to vector<8xf32>
    %70 = vector.shape_cast %69 : vector<8xf32> to vector<8x1xf32>
    %71 = arith.truncf %68 : vector<8x8xf32> to vector<8x8xbf16>
    %cst_46 = arith.constant dense<0.000000e+00> : vector<8x8xf32>
    %72 = tpu.matmul %71, %62, %cst_46 {dimension_numbers = #tpu.dot_dimension_numbers<[1], [0], [0], [1], [0, 0, 1, 1], [], []>} : vector<8x8xbf16>, vector<8x8xbf16>, vector<8x8xf32> -> vector<8x8xf32>
    %73 = tpu.reciprocal %70 {approx = true} : vector<8x1xf32> -> vector<8x1xf32>
    %74 = vector.broadcast %73 : vector<8x1xf32> to vector<8x8xf32>
    %75 = arith.mulf %72, %74 : vector<8x8xf32>
    %76 = tpu.concatenate %18, %37, %56, %75 in 1 : vector<8x8xf32>, vector<8x8xf32>, vector<8x8xf32>, vector<8x8xf32> -> vector<8x32xf32>
    %77 = arith.truncf %76 : vector<8x32xf32> to vector<8x32xbf16>
    %c0_47 = arith.constant 0 : index
    %c0_48 = arith.constant 0 : index
    %c0_49 = arith.constant 0 : index
    %78 = vector.load %arg6[%c0_47, %c0_48, %c0_49] : memref<1x8x32xbf16, #tpu.memory_space<vmem>>, vector<1x8x32xbf16>
    %79 = vector.shape_cast %78 : vector<1x8x32xbf16> to vector<8x32xbf16>
    %80 = vector.shape_cast %77 : vector<8x32xbf16> to vector<1x8x32xbf16>
    tpu.vector_store %arg6[%c0_47, %c0_48, %c0_49], %80 {strides = array<i32>} : memref<1x8x32xbf16, #tpu.memory_space<vmem>>, vector<1x8x32xbf16>,
    return
  }
  func.func @transform_0(%arg0: i32, %arg1: i32, %arg2: i32) -> (i32, i32, i32) {
    %c0_i32 = arith.constant 0 : i32
    return %arg0, %arg2, %arg1 : i32, i32, i32
  }
  func.func @transform_1(%arg0: i32, %arg1: i32, %arg2: i32) -> (i32, i32, i32) {
    %c0_i32 = arith.constant 0 : i32
    %c0_i32_0 = arith.constant 0 : i32
    return %arg0, %c0_i32, %arg1 : i32, i32, i32
  }
  func.func @transform_2(%arg0: i32, %arg1: i32, %arg2: i32) -> (i32, i32, i32) {
    %c0_i32 = arith.constant 0 : i32
    %c0_i32_0 = arith.constant 0 : i32
    return %arg0, %c0_i32, %arg1 : i32, i32, i32
  }
  func.func @transform_3(%arg0: i32, %arg1: i32, %arg2: i32) -> (i32, i32, i32) {
    %c0_i32 = arith.constant 0 : i32
    return %arg0, %arg2, %arg1 : i32, i32, i32
  }
}

module attributes {stable_mosaic.version = 11 : i64} {
  func.func @kernel(%arg0: i32, %arg1: i32, %arg2: memref<16x32xbf16, #tpu.memory_space<vmem>>, %arg3: memref<32x32xbf16, #tpu.memory_space<vmem>>, %arg4: memref<1x32xf32, #tpu.memory_space<vmem>>, %arg5: memref<16x32xbf16, #tpu.memory_space<vmem>>, %arg6: memref<1x32xf32, #tpu.memory_space<vmem>>, %arg7: memref<1x32xf32, #tpu.memory_space<vmem>>, %arg8: memref<16x32xbf16, #tpu.memory_space<vmem>>, %arg9: memref<16x32xf32, #tpu.memory_space<vmem>>) attributes {dimension_semantics = [#tpu.dimension_semantics<parallel>, #tpu.dimension_semantics<arbitrary>], iteration_bounds = array<i64: 1, 1>, scalar_prefetch = 0 : i64, scratch_operands = 1 : i64, tpu.core_type = #tpu.core_type<tc>, window_params = [{transform_indices = @transform_0, window_bounds = array<i64: 16, 32>}, {transform_indices = @transform_1, window_bounds = array<i64: 32, 32>}, {pipeline_mode = #tpu.pipeline_mode<synchronous>, transform_indices = @transform_2, window_bounds = array<i64: 1, 32>}, {transform_indices = @transform_3, window_bounds = array<i64: 16, 32>}, {pipeline_mode = #tpu.pipeline_mode<synchronous>, transform_indices = @transform_4, window_bounds = array<i64: 1, 32>}, {pipeline_mode = #tpu.pipeline_mode<synchronous>, transform_indices = @transform_5, window_bounds = array<i64: 1, 32>}, {transform_indices = @transform_6, window_bounds = array<i64: 16, 32>}]} {
    %c0_i32 = arith.constant 0 : i32
    %0 = arith.cmpi eq, %arg1, %c0_i32 : i32
    %1 = arith.extui %0 : i1 to i32
    %c0_i32_0 = arith.constant 0 : i32
    %2 = arith.cmpi ne, %1, %c0_i32_0 : i32
    scf.if %2 {
      %cst_10 = arith.constant 0.000000e+00 : f32
      %12 = vector.broadcast %cst_10 : f32 to vector<16x32xf32>
      %c0_11 = arith.constant 0 : index
      %c0_12 = arith.constant 0 : index
      %13 = vector.load %arg9[%c0_11, %c0_12] : memref<16x32xf32, #tpu.memory_space<vmem>>, vector<16x32xf32>
      tpu.vector_store %arg9[%c0_11, %c0_12], %12 {strides = array<i32>} : memref<16x32xf32, #tpu.memory_space<vmem>>, vector<16x32xf32>,
    } else {
    }
    %c0 = arith.constant 0 : index
    %c0_1 = arith.constant 0 : index
    %3 = vector.load %arg9[%c0, %c0_1] : memref<16x32xf32, #tpu.memory_space<vmem>>, vector<16x32xf32>
    %c0_2 = arith.constant 0 : index
    %c0_3 = arith.constant 0 : index
    %4 = vector.load %arg2[%c0_2, %c0_3] : memref<16x32xbf16, #tpu.memory_space<vmem>>, vector<16x32xbf16>
    %c0_4 = arith.constant 0 : index
    %c0_5 = arith.constant 0 : index
    %5 = vector.load %arg3[%c0_4, %c0_5] : memref<32x32xbf16, #tpu.memory_space<vmem>>, vector<32x32xbf16>
    %cst = arith.constant dense<0.000000e+00> : vector<16x32xf32>
    %6 = tpu.matmul %4, %5, %cst {dimension_numbers = #tpu.dot_dimension_numbers<[1], [0], [0], [1], [0, 0, 1, 1], [], []>} : vector<16x32xbf16>, vector<32x32xbf16>, vector<16x32xf32> -> vector<16x32xf32>
    %7 = arith.addf %3, %6 : vector<16x32xf32>
    %c0_6 = arith.constant 0 : index
    %c0_7 = arith.constant 0 : index
    %8 = vector.load %arg9[%c0_6, %c0_7] : memref<16x32xf32, #tpu.memory_space<vmem>>, vector<16x32xf32>
    tpu.vector_store %arg9[%c0_6, %c0_7], %7 {strides = array<i32>} : memref<16x32xf32, #tpu.memory_space<vmem>>, vector<16x32xf32>,
    %c0_i32_8 = arith.constant 0 : i32
    %9 = arith.cmpi eq, %arg1, %c0_i32_8 : i32
    %10 = arith.extui %9 : i1 to i32
    %c0_i32_9 = arith.constant 0 : i32
    %11 = arith.cmpi ne, %10, %c0_i32_9 : i32
    scf.if %11 {
      %c0_10 = arith.constant 0 : index
      %c0_11 = arith.constant 0 : index
      %12 = vector.load %arg9[%c0_10, %c0_11] : memref<16x32xf32, #tpu.memory_space<vmem>>, vector<16x32xf32>
      %c0_12 = arith.constant 0 : index
      %c0_13 = arith.constant 0 : index
      %13 = vector.load %arg4[%c0_12, %c0_13] : memref<1x32xf32, #tpu.memory_space<vmem>>, vector<1x32xf32>
      %14 = vector.broadcast %13 : vector<1x32xf32> to vector<16x32xf32>
      %15 = arith.addf %12, %14 : vector<16x32xf32>
      %c0_14 = arith.constant 0 : index
      %c0_15 = arith.constant 0 : index
      %16 = vector.load %arg5[%c0_14, %c0_15] : memref<16x32xbf16, #tpu.memory_space<vmem>>, vector<16x32xbf16>
      %17 = arith.extf %16 : vector<16x32xbf16> to vector<16x32xf32>
      %18 = arith.addf %15, %17 : vector<16x32xf32>
      %c0_16 = arith.constant 0 : index
      %c0_17 = arith.constant 0 : index
      %19 = vector.load %arg6[%c0_16, %c0_17] : memref<1x32xf32, #tpu.memory_space<vmem>>, vector<1x32xf32>
      %c0_18 = arith.constant 0 : index
      %c0_19 = arith.constant 0 : index
      %20 = vector.load %arg7[%c0_18, %c0_19] : memref<1x32xf32, #tpu.memory_space<vmem>>, vector<1x32xf32>
      %cst_20 = arith.constant dense<0.000000e+00> : vector<16xf32>
      %21 = vector.multi_reduction <add>, %18, %cst_20 [1] : vector<16x32xf32> to vector<16xf32>
      %22 = vector.shape_cast %21 : vector<16xf32> to vector<16x1xf32>
      %cst_21 = arith.constant 3.200000e+01 : f32
      %23 = vector.broadcast %cst_21 : f32 to vector<16x1xf32>
      %24 = arith.divf %22, %23 : vector<16x1xf32>
      %25 = vector.broadcast %24 : vector<16x1xf32> to vector<16x32xf32>
      %26 = arith.subf %18, %25 : vector<16x32xf32>
      %27 = arith.mulf %26, %26 : vector<16x32xf32>
      %cst_22 = arith.constant dense<0.000000e+00> : vector<16xf32>
      %28 = vector.multi_reduction <add>, %27, %cst_22 [1] : vector<16x32xf32> to vector<16xf32>
      %29 = vector.shape_cast %28 : vector<16xf32> to vector<16x1xf32>
      %cst_23 = arith.constant 3.200000e+01 : f32
      %30 = vector.broadcast %cst_23 : f32 to vector<16x1xf32>
      %31 = arith.divf %29, %30 : vector<16x1xf32>
      %32 = vector.broadcast %24 : vector<16x1xf32> to vector<16x32xf32>
      %33 = arith.subf %18, %32 : vector<16x32xf32>
      %cst_24 = arith.constant 9.99999996E-13 : f32
      %34 = vector.broadcast %cst_24 : f32 to vector<16x1xf32>
      %35 = arith.addf %31, %34 : vector<16x1xf32>
      %36 = math.rsqrt %35 : vector<16x1xf32>
      %37 = vector.broadcast %36 : vector<16x1xf32> to vector<16x32xf32>
      %38 = arith.mulf %33, %37 : vector<16x32xf32>
      %39 = vector.broadcast %19 : vector<1x32xf32> to vector<16x32xf32>
      %40 = arith.mulf %38, %39 : vector<16x32xf32>
      %41 = vector.broadcast %20 : vector<1x32xf32> to vector<16x32xf32>
      %42 = arith.addf %40, %41 : vector<16x32xf32>
      %43 = arith.truncf %42 : vector<16x32xf32> to vector<16x32xbf16>
      %c0_25 = arith.constant 0 : index
      %c0_26 = arith.constant 0 : index
      %44 = vector.load %arg8[%c0_25, %c0_26] : memref<16x32xbf16, #tpu.memory_space<vmem>>, vector<16x32xbf16>
      tpu.vector_store %arg8[%c0_25, %c0_26], %43 {strides = array<i32>} : memref<16x32xbf16, #tpu.memory_space<vmem>>, vector<16x32xbf16>,
    } else {
    }
    return
  }
  func.func @transform_0(%arg0: i32, %arg1: i32) -> (i32, i32) {
    %c0_i32 = arith.constant 0 : i32
    return %arg0, %arg1 : i32, i32
  }
  func.func @transform_1(%arg0: i32, %arg1: i32) -> (i32, i32) {
    %c0_i32 = arith.constant 0 : i32
    %c0_i32_0 = arith.constant 0 : i32
    return %arg1, %c0_i32 : i32, i32
  }
  func.func @transform_2(%arg0: i32, %arg1: i32) -> (i32, i32) {
    %c0_i32 = arith.constant 0 : i32
    %c0_i32_0 = arith.constant 0 : i32
    %c0_i32_1 = arith.constant 0 : i32
    return %c0_i32, %c0_i32_0 : i32, i32
  }
  func.func @transform_3(%arg0: i32, %arg1: i32) -> (i32, i32) {
    %c0_i32 = arith.constant 0 : i32
    %c0_i32_0 = arith.constant 0 : i32
    return %arg0, %c0_i32 : i32, i32
  }
  func.func @transform_4(%arg0: i32, %arg1: i32) -> (i32, i32) {
    %c0_i32 = arith.constant 0 : i32
    %c0_i32_0 = arith.constant 0 : i32
    %c0_i32_1 = arith.constant 0 : i32
    return %c0_i32, %c0_i32_0 : i32, i32
  }
  func.func @transform_5(%arg0: i32, %arg1: i32) -> (i32, i32) {
    %c0_i32 = arith.constant 0 : i32
    %c0_i32_0 = arith.constant 0 : i32
    %c0_i32_1 = arith.constant 0 : i32
    return %c0_i32, %c0_i32_0 : i32, i32
  }
  func.func @transform_6(%arg0: i32, %arg1: i32) -> (i32, i32) {
    %c0_i32 = arith.constant 0 : i32
    %c0_i32_0 = arith.constant 0 : i32
    return %arg0, %c0_i32 : i32, i32
  }
}

module attributes {stable_mosaic.version = 11 : i64} {
  func.func @_linear_kernel(%arg0: i32, %arg1: i32, %arg2: i32, %arg3: memref<16x32xbf16, #tpu.memory_space<vmem>>, %arg4: memref<32x64xbf16, #tpu.memory_space<vmem>>, %arg5: memref<1x64xf32, #tpu.memory_space<vmem>>, %arg6: memref<16x64xbf16, #tpu.memory_space<vmem>>, %arg7: memref<16x64xf32, #tpu.memory_space<vmem>>) attributes {dimension_semantics = [#tpu.dimension_semantics<parallel>, #tpu.dimension_semantics<parallel>, #tpu.dimension_semantics<arbitrary>], iteration_bounds = array<i64: 1, 1, 1>, scalar_prefetch = 0 : i64, scratch_operands = 1 : i64, tpu.core_type = #tpu.core_type<tc>, window_params = [{transform_indices = @transform_0, window_bounds = array<i64: 16, 32>}, {transform_indices = @transform_1, window_bounds = array<i64: 32, 64>}, {transform_indices = @transform_2, window_bounds = array<i64: 1, 64>}, {transform_indices = @transform_3, window_bounds = array<i64: 16, 64>}]} {
    %c0_i32 = arith.constant 0 : i32
    %0 = arith.cmpi eq, %arg2, %c0_i32 : i32
    %1 = arith.extui %0 : i1 to i32
    %c0_i32_0 = arith.constant 0 : i32
    %2 = arith.cmpi ne, %1, %c0_i32_0 : i32
    scf.if %2 {
      %cst_10 = arith.constant 0.000000e+00 : f32
      %12 = vector.broadcast %cst_10 : f32 to vector<16x64xf32>
      %c0_11 = arith.constant 0 : index
      %c0_12 = arith.constant 0 : index
      %13 = vector.load %arg7[%c0_11, %c0_12] : memref<16x64xf32, #tpu.memory_space<vmem>>, vector<16x64xf32>
      tpu.vector_store %arg7[%c0_11, %c0_12], %12 {strides = array<i32>} : memref<16x64xf32, #tpu.memory_space<vmem>>, vector<16x64xf32>,
    } else {
    }
    %c0 = arith.constant 0 : index
    %c0_1 = arith.constant 0 : index
    %3 = vector.load %arg7[%c0, %c0_1] : memref<16x64xf32, #tpu.memory_space<vmem>>, vector<16x64xf32>
    %c0_2 = arith.constant 0 : index
    %c0_3 = arith.constant 0 : index
    %4 = vector.load %arg3[%c0_2, %c0_3] : memref<16x32xbf16, #tpu.memory_space<vmem>>, vector<16x32xbf16>
    %c0_4 = arith.constant 0 : index
    %c0_5 = arith.constant 0 : index
    %5 = vector.load %arg4[%c0_4, %c0_5] : memref<32x64xbf16, #tpu.memory_space<vmem>>, vector<32x64xbf16>
    %cst = arith.constant dense<0.000000e+00> : vector<16x64xf32>
    %6 = tpu.matmul %4, %5, %cst {dimension_numbers = #tpu.dot_dimension_numbers<[1], [0], [0], [1], [0, 0, 1, 1], [], []>} : vector<16x32xbf16>, vector<32x64xbf16>, vector<16x64xf32> -> vector<16x64xf32>
    %7 = arith.addf %3, %6 : vector<16x64xf32>
    %c0_6 = arith.constant 0 : index
    %c0_7 = arith.constant 0 : index
    %8 = vector.load %arg7[%c0_6, %c0_7] : memref<16x64xf32, #tpu.memory_space<vmem>>, vector<16x64xf32>
    tpu.vector_store %arg7[%c0_6, %c0_7], %7 {strides = array<i32>} : memref<16x64xf32, #tpu.memory_space<vmem>>, vector<16x64xf32>,
    %c0_i32_8 = arith.constant 0 : i32
    %9 = arith.cmpi eq, %arg2, %c0_i32_8 : i32
    %10 = arith.extui %9 : i1 to i32
    %c0_i32_9 = arith.constant 0 : i32
    %11 = arith.cmpi ne, %10, %c0_i32_9 : i32
    scf.if %11 {
      %c0_10 = arith.constant 0 : index
      %c0_11 = arith.constant 0 : index
      %12 = vector.load %arg7[%c0_10, %c0_11] : memref<16x64xf32, #tpu.memory_space<vmem>>, vector<16x64xf32>
      %c0_12 = arith.constant 0 : index
      %c0_13 = arith.constant 0 : index
      %13 = vector.load %arg5[%c0_12, %c0_13] : memref<1x64xf32, #tpu.memory_space<vmem>>, vector<1x64xf32>
      %14 = vector.broadcast %13 : vector<1x64xf32> to vector<16x64xf32>
      %15 = arith.addf %12, %14 : vector<16x64xf32>
      %cst_14 = arith.constant 5.000000e-01 : f32
      %16 = vector.broadcast %cst_14 : f32 to vector<16x64xf32>
      %17 = arith.mulf %16, %15 : vector<16x64xf32>
      %cst_15 = arith.constant 4.471500e-02 : f32
      %18 = vector.broadcast %cst_15 : f32 to vector<16x64xf32>
      %19 = arith.mulf %18, %15 : vector<16x64xf32>
      %20 = arith.mulf %19, %15 : vector<16x64xf32>
      %21 = arith.mulf %20, %15 : vector<16x64xf32>
      %22 = arith.addf %15, %21 : vector<16x64xf32>
      %cst_16 = arith.constant 0.797884583 : f32
      %23 = vector.broadcast %cst_16 : f32 to vector<16x64xf32>
      %24 = arith.mulf %23, %22 : vector<16x64xf32>
      %25 = math.tanh %24 : vector<16x64xf32>
      %cst_17 = arith.constant 1.000000e+00 : f32
      %26 = vector.broadcast %cst_17 : f32 to vector<16x64xf32>
      %27 = arith.addf %26, %25 : vector<16x64xf32>
      %28 = arith.mulf %17, %27 : vector<16x64xf32>
      %29 = arith.truncf %28 : vector<16x64xf32> to vector<16x64xbf16>
      %c0_18 = arith.constant 0 : index
      %c0_19 = arith.constant 0 : index
      %30 = vector.load %arg6[%c0_18, %c0_19] : memref<16x64xbf16, #tpu.memory_space<vmem>>, vector<16x64xbf16>
      tpu.vector_store %arg6[%c0_18, %c0_19], %29 {strides = array<i32>} : memref<16x64xbf16, #tpu.memory_space<vmem>>, vector<16x64xbf16>,
    } else {
    }
    return
  }
  func.func @transform_0(%arg0: i32, %arg1: i32, %arg2: i32) -> (i32, i32) {
    %c0_i32 = arith.constant 0 : i32
    return %arg0, %arg2 : i32, i32
  }
  func.func @transform_1(%arg0: i32, %arg1: i32, %arg2: i32) -> (i32, i32) {
    %c0_i32 = arith.constant 0 : i32
    return %arg2, %arg1 : i32, i32
  }
  func.func @transform_2(%arg0: i32, %arg1: i32, %arg2: i32) -> (i32, i32) {
    %c0_i32 = arith.constant 0 : i32
    %c0_i32_0 = arith.constant 0 : i32
    return %c0_i32, %arg1 : i32, i32
  }
  func.func @transform_3(%arg0: i32, %arg1: i32, %arg2: i32) -> (i32, i32) {
    %c0_i32 = arith.constant 0 : i32
    return %arg0, %arg1 : i32, i32
  }
}

module attributes {stable_mosaic.version = 11 : i64} {
  func.func @kernel(%arg0: i32, %arg1: i32, %arg2: memref<16x64xbf16, #tpu.memory_space<vmem>>, %arg3: memref<64x32xbf16, #tpu.memory_space<vmem>>, %arg4: memref<1x32xf32, #tpu.memory_space<vmem>>, %arg5: memref<16x32xbf16, #tpu.memory_space<vmem>>, %arg6: memref<1x32xf32, #tpu.memory_space<vmem>>, %arg7: memref<1x32xf32, #tpu.memory_space<vmem>>, %arg8: memref<16x32xbf16, #tpu.memory_space<vmem>>, %arg9: memref<16x32xf32, #tpu.memory_space<vmem>>) attributes {dimension_semantics = [#tpu.dimension_semantics<parallel>, #tpu.dimension_semantics<arbitrary>], iteration_bounds = array<i64: 1, 1>, scalar_prefetch = 0 : i64, scratch_operands = 1 : i64, tpu.core_type = #tpu.core_type<tc>, window_params = [{transform_indices = @transform_0, window_bounds = array<i64: 16, 64>}, {transform_indices = @transform_1, window_bounds = array<i64: 64, 32>}, {pipeline_mode = #tpu.pipeline_mode<synchronous>, transform_indices = @transform_2, window_bounds = array<i64: 1, 32>}, {transform_indices = @transform_3, window_bounds = array<i64: 16, 32>}, {pipeline_mode = #tpu.pipeline_mode<synchronous>, transform_indices = @transform_4, window_bounds = array<i64: 1, 32>}, {pipeline_mode = #tpu.pipeline_mode<synchronous>, transform_indices = @transform_5, window_bounds = array<i64: 1, 32>}, {transform_indices = @transform_6, window_bounds = array<i64: 16, 32>}]} {
    %c0_i32 = arith.constant 0 : i32
    %0 = arith.cmpi eq, %arg1, %c0_i32 : i32
    %1 = arith.extui %0 : i1 to i32
    %c0_i32_0 = arith.constant 0 : i32
    %2 = arith.cmpi ne, %1, %c0_i32_0 : i32
    scf.if %2 {
      %cst_10 = arith.constant 0.000000e+00 : f32
      %12 = vector.broadcast %cst_10 : f32 to vector<16x32xf32>
      %c0_11 = arith.constant 0 : index
      %c0_12 = arith.constant 0 : index
      %13 = vector.load %arg9[%c0_11, %c0_12] : memref<16x32xf32, #tpu.memory_space<vmem>>, vector<16x32xf32>
      tpu.vector_store %arg9[%c0_11, %c0_12], %12 {strides = array<i32>} : memref<16x32xf32, #tpu.memory_space<vmem>>, vector<16x32xf32>,
    } else {
    }
    %c0 = arith.constant 0 : index
    %c0_1 = arith.constant 0 : index
    %3 = vector.load %arg9[%c0, %c0_1] : memref<16x32xf32, #tpu.memory_space<vmem>>, vector<16x32xf32>
    %c0_2 = arith.constant 0 : index
    %c0_3 = arith.constant 0 : index
    %4 = vector.load %arg2[%c0_2, %c0_3] : memref<16x64xbf16, #tpu.memory_space<vmem>>, vector<16x64xbf16>
    %c0_4 = arith.constant 0 : index
    %c0_5 = arith.constant 0 : index
    %5 = vector.load %arg3[%c0_4, %c0_5] : memref<64x32xbf16, #tpu.memory_space<vmem>>, vector<64x32xbf16>
    %cst = arith.constant dense<0.000000e+00> : vector<16x32xf32>
    %6 = tpu.matmul %4, %5, %cst {dimension_numbers = #tpu.dot_dimension_numbers<[1], [0], [0], [1], [0, 0, 1, 1], [], []>} : vector<16x64xbf16>, vector<64x32xbf16>, vector<16x32xf32> -> vector<16x32xf32>
    %7 = arith.addf %3, %6 : vector<16x32xf32>
    %c0_6 = arith.constant 0 : index
    %c0_7 = arith.constant 0 : index
    %8 = vector.load %arg9[%c0_6, %c0_7] : memref<16x32xf32, #tpu.memory_space<vmem>>, vector<16x32xf32>
    tpu.vector_store %arg9[%c0_6, %c0_7], %7 {strides = array<i32>} : memref<16x32xf32, #tpu.memory_space<vmem>>, vector<16x32xf32>,
    %c0_i32_8 = arith.constant 0 : i32
    %9 = arith.cmpi eq, %arg1, %c0_i32_8 : i32
    %10 = arith.extui %9 : i1 to i32
    %c0_i32_9 = arith.constant 0 : i32
    %11 = arith.cmpi ne, %10, %c0_i32_9 : i32
    scf.if %11 {
      %c0_10 = arith.constant 0 : index
      %c0_11 = arith.constant 0 : index
      %12 = vector.load %arg9[%c0_10, %c0_11] : memref<16x32xf32, #tpu.memory_space<vmem>>, vector<16x32xf32>
      %c0_12 = arith.constant 0 : index
      %c0_13 = arith.constant 0 : index
      %13 = vector.load %arg4[%c0_12, %c0_13] : memref<1x32xf32, #tpu.memory_space<vmem>>, vector<1x32xf32>
      %14 = vector.broadcast %13 : vector<1x32xf32> to vector<16x32xf32>
      %15 = arith.addf %12, %14 : vector<16x32xf32>
      %c0_14 = arith.constant 0 : index
      %c0_15 = arith.constant 0 : index
      %16 = vector.load %arg5[%c0_14, %c0_15] : memref<16x32xbf16, #tpu.memory_space<vmem>>, vector<16x32xbf16>
      %17 = arith.extf %16 : vector<16x32xbf16> to vector<16x32xf32>
      %18 = arith.addf %15, %17 : vector<16x32xf32>
      %c0_16 = arith.constant 0 : index
      %c0_17 = arith.constant 0 : index
      %19 = vector.load %arg6[%c0_16, %c0_17] : memref<1x32xf32, #tpu.memory_space<vmem>>, vector<1x32xf32>
      %c0_18 = arith.constant 0 : index
      %c0_19 = arith.constant 0 : index
      %20 = vector.load %arg7[%c0_18, %c0_19] : memref<1x32xf32, #tpu.memory_space<vmem>>, vector<1x32xf32>
      %cst_20 = arith.constant dense<0.000000e+00> : vector<16xf32>
      %21 = vector.multi_reduction <add>, %18, %cst_20 [1] : vector<16x32xf32> to vector<16xf32>
      %22 = vector.shape_cast %21 : vector<16xf32> to vector<16x1xf32>
      %cst_21 = arith.constant 3.200000e+01 : f32
      %23 = vector.broadcast %cst_21 : f32 to vector<16x1xf32>
      %24 = arith.divf %22, %23 : vector<16x1xf32>
      %25 = vector.broadcast %24 : vector<16x1xf32> to vector<16x32xf32>
      %26 = arith.subf %18, %25 : vector<16x32xf32>
      %27 = arith.mulf %26, %26 : vector<16x32xf32>
      %cst_22 = arith.constant dense<0.000000e+00> : vector<16xf32>
      %28 = vector.multi_reduction <add>, %27, %cst_22 [1] : vector<16x32xf32> to vector<16xf32>
      %29 = vector.shape_cast %28 : vector<16xf32> to vector<16x1xf32>
      %cst_23 = arith.constant 3.200000e+01 : f32
      %30 = vector.broadcast %cst_23 : f32 to vector<16x1xf32>
      %31 = arith.divf %29, %30 : vector<16x1xf32>
      %32 = vector.broadcast %24 : vector<16x1xf32> to vector<16x32xf32>
      %33 = arith.subf %18, %32 : vector<16x32xf32>
      %cst_24 = arith.constant 9.99999996E-13 : f32
      %34 = vector.broadcast %cst_24 : f32 to vector<16x1xf32>
      %35 = arith.addf %31, %34 : vector<16x1xf32>
      %36 = math.rsqrt %35 : vector<16x1xf32>
      %37 = vector.broadcast %36 : vector<16x1xf32> to vector<16x32xf32>
      %38 = arith.mulf %33, %37 : vector<16x32xf32>
      %39 = vector.broadcast %19 : vector<1x32xf32> to vector<16x32xf32>
      %40 = arith.mulf %38, %39 : vector<16x32xf32>
      %41 = vector.broadcast %20 : vector<1x32xf32> to vector<16x32xf32>
      %42 = arith.addf %40, %41 : vector<16x32xf32>
      %43 = arith.truncf %42 : vector<16x32xf32> to vector<16x32xbf16>
      %c0_25 = arith.constant 0 : index
      %c0_26 = arith.constant 0 : index
      %44 = vector.load %arg8[%c0_25, %c0_26] : memref<16x32xbf16, #tpu.memory_space<vmem>>, vector<16x32xbf16>
      tpu.vector_store %arg8[%c0_25, %c0_26], %43 {strides = array<i32>} : memref<16x32xbf16, #tpu.memory_space<vmem>>, vector<16x32xbf16>,
    } else {
    }
    return
  }
  func.func @transform_0(%arg0: i32, %arg1: i32) -> (i32, i32) {
    %c0_i32 = arith.constant 0 : i32
    return %arg0, %arg1 : i32, i32
  }
  func.func @transform_1(%arg0: i32, %arg1: i32) -> (i32, i32) {
    %c0_i32 = arith.constant 0 : i32
    %c0_i32_0 = arith.constant 0 : i32
    return %arg1, %c0_i32 : i32, i32
  }
  func.func @transform_2(%arg0: i32, %arg1: i32) -> (i32, i32) {
    %c0_i32 = arith.constant 0 : i32
    %c0_i32_0 = arith.constant 0 : i32
    %c0_i32_1 = arith.constant 0 : i32
    return %c0_i32, %c0_i32_0 : i32, i32
  }
  func.func @transform_3(%arg0: i32, %arg1: i32) -> (i32, i32) {
    %c0_i32 = arith.constant 0 : i32
    %c0_i32_0 = arith.constant 0 : i32
    return %arg0, %c0_i32 : i32, i32
  }
  func.func @transform_4(%arg0: i32, %arg1: i32) -> (i32, i32) {
    %c0_i32 = arith.constant 0 : i32
    %c0_i32_0 = arith.constant 0 : i32
    %c0_i32_1 = arith.constant 0 : i32
    return %c0_i32, %c0_i32_0 : i32, i32
  }
  func.func @transform_5(%arg0: i32, %arg1: i32) -> (i32, i32) {
    %c0_i32 = arith.constant 0 : i32
    %c0_i32_0 = arith.constant 0 : i32
    %c0_i32_1 = arith.constant 0 : i32
    return %c0_i32, %c0_i32_0 : i32, i32
  }
  func.func @transform_6(%arg0: i32, %arg1: i32) -> (i32, i32) {
    %c0_i32 = arith.constant 0 : i32
    %c0_i32_0 = arith.constant 0 : i32
    return %arg0, %c0_i32 : i32, i32
  }
}

module attributes {stable_mosaic.version = 11 : i64} {
  func.func @kernel(%arg0: i32, %arg1: i32, %arg2: memref<16x64xbf16, #tpu.memory_space<vmem>>, %arg3: memref<64x32xbf16, #tpu.memory_space<vmem>>, %arg4: memref<1x32xf32, #tpu.memory_space<vmem>>, %arg5: memref<16x32xbf16, #tpu.memory_space<vmem>>, %arg6: memref<16x32xbf16, #tpu.memory_space<vmem>>, %arg7: memref<1x32xf32, #tpu.memory_space<vmem>>, %arg8: memref<1x32xf32, #tpu.memory_space<vmem>>, %arg9: memref<16x32xf32, #tpu.memory_space<vmem>>, %arg10: memref<16x32xf32, #tpu.memory_space<vmem>>) attributes {dimension_semantics = [#tpu.dimension_semantics<parallel>, #tpu.dimension_semantics<arbitrary>], iteration_bounds = array<i64: 1, 1>, scalar_prefetch = 0 : i64, scratch_operands = 1 : i64, tpu.core_type = #tpu.core_type<tc>, window_params = [{transform_indices = @transform_0, window_bounds = array<i64: 16, 64>}, {transform_indices = @transform_1, window_bounds = array<i64: 64, 32>}, {pipeline_mode = #tpu.pipeline_mode<synchronous>, transform_indices = @transform_2, window_bounds = array<i64: 1, 32>}, {transform_indices = @transform_3, window_bounds = array<i64: 16, 32>}, {transform_indices = @transform_4, window_bounds = array<i64: 16, 32>}, {pipeline_mode = #tpu.pipeline_mode<synchronous>, transform_indices = @transform_5, window_bounds = array<i64: 1, 32>}, {pipeline_mode = #tpu.pipeline_mode<synchronous>, transform_indices = @transform_6, window_bounds = array<i64: 1, 32>}, {transform_indices = @transform_7, window_bounds = array<i64: 16, 32>}]} {
    %c0_i32 = arith.constant 0 : i32
    %0 = arith.cmpi eq, %arg1, %c0_i32 : i32
    %1 = arith.extui %0 : i1 to i32
    %c0_i32_0 = arith.constant 0 : i32
    %2 = arith.cmpi ne, %1, %c0_i32_0 : i32
    scf.if %2 {
      %cst_10 = arith.constant 0.000000e+00 : f32
      %12 = vector.broadcast %cst_10 : f32 to vector<16x32xf32>
      %c0_11 = arith.constant 0 : index
      %c0_12 = arith.constant 0 : index
      %13 = vector.load %arg10[%c0_11, %c0_12] : memref<16x32xf32, #tpu.memory_space<vmem>>, vector<16x32xf32>
      tpu.vector_store %arg10[%c0_11, %c0_12], %12 {strides = array<i32>} : memref<16x32xf32, #tpu.memory_space<vmem>>, vector<16x32xf32>,
    } else {
    }
    %c0 = arith.constant 0 : index
    %c0_1 = arith.constant 0 : index
    %3 = vector.load %arg10[%c0, %c0_1] : memref<16x32xf32, #tpu.memory_space<vmem>>, vector<16x32xf32>
    %c0_2 = arith.constant 0 : index
    %c0_3 = arith.constant 0 : index
    %4 = vector.load %arg2[%c0_2, %c0_3] : memref<16x64xbf16, #tpu.memory_space<vmem>>, vector<16x64xbf16>
    %c0_4 = arith.constant 0 : index
    %c0_5 = arith.constant 0 : index
    %5 = vector.load %arg3[%c0_4, %c0_5] : memref<64x32xbf16, #tpu.memory_space<vmem>>, vector<64x32xbf16>
    %cst = arith.constant dense<0.000000e+00> : vector<16x32xf32>
    %6 = tpu.matmul %4, %5, %cst {dimension_numbers = #tpu.dot_dimension_numbers<[1], [0], [0], [1], [0, 0, 1, 1], [], []>} : vector<16x64xbf16>, vector<64x32xbf16>, vector<16x32xf32> -> vector<16x32xf32>
    %7 = arith.addf %3, %6 : vector<16x32xf32>
    %c0_6 = arith.constant 0 : index
    %c0_7 = arith.constant 0 : index
    %8 = vector.load %arg10[%c0_6, %c0_7] : memref<16x32xf32, #tpu.memory_space<vmem>>, vector<16x32xf32>
    tpu.vector_store %arg10[%c0_6, %c0_7], %7 {strides = array<i32>} : memref<16x32xf32, #tpu.memory_space<vmem>>, vector<16x32xf32>,
    %c0_i32_8 = arith.constant 0 : i32
    %9 = arith.cmpi eq, %arg1, %c0_i32_8 : i32
    %10 = arith.extui %9 : i1 to i32
    %c0_i32_9 = arith.constant 0 : i32
    %11 = arith.cmpi ne, %10, %c0_i32_9 : i32
    scf.if %11 {
      %c0_10 = arith.constant 0 : index
      %c0_11 = arith.constant 0 : index
      %12 = vector.load %arg10[%c0_10, %c0_11] : memref<16x32xf32, #tpu.memory_space<vmem>>, vector<16x32xf32>
      %c0_12 = arith.constant 0 : index
      %c0_13 = arith.constant 0 : index
      %13 = vector.load %arg4[%c0_12, %c0_13] : memref<1x32xf32, #tpu.memory_space<vmem>>, vector<1x32xf32>
      %14 = vector.broadcast %13 : vector<1x32xf32> to vector<16x32xf32>
      %15 = arith.addf %12, %14 : vector<16x32xf32>
      %c0_14 = arith.constant 0 : index
      %c0_15 = arith.constant 0 : index
      %16 = vector.load %arg5[%c0_14, %c0_15] : memref<16x32xbf16, #tpu.memory_space<vmem>>, vector<16x32xbf16>
      %17 = arith.extf %16 : vector<16x32xbf16> to vector<16x32xf32>
      %18 = arith.addf %15, %17 : vector<16x32xf32>
      %c0_16 = arith.constant 0 : index
      %c0_17 = arith.constant 0 : index
      %19 = vector.load %arg7[%c0_16, %c0_17] : memref<1x32xf32, #tpu.memory_space<vmem>>, vector<1x32xf32>
      %c0_18 = arith.constant 0 : index
      %c0_19 = arith.constant 0 : index
      %20 = vector.load %arg8[%c0_18, %c0_19] : memref<1x32xf32, #tpu.memory_space<vmem>>, vector<1x32xf32>
      %cst_20 = arith.constant dense<0.000000e+00> : vector<16xf32>
      %21 = vector.multi_reduction <add>, %18, %cst_20 [1] : vector<16x32xf32> to vector<16xf32>
      %22 = vector.shape_cast %21 : vector<16xf32> to vector<16x1xf32>
      %cst_21 = arith.constant 3.200000e+01 : f32
      %23 = vector.broadcast %cst_21 : f32 to vector<16x1xf32>
      %24 = arith.divf %22, %23 : vector<16x1xf32>
      %25 = vector.broadcast %24 : vector<16x1xf32> to vector<16x32xf32>
      %26 = arith.subf %18, %25 : vector<16x32xf32>
      %27 = arith.mulf %26, %26 : vector<16x32xf32>
      %cst_22 = arith.constant dense<0.000000e+00> : vector<16xf32>
      %28 = vector.multi_reduction <add>, %27, %cst_22 [1] : vector<16x32xf32> to vector<16xf32>
      %29 = vector.shape_cast %28 : vector<16xf32> to vector<16x1xf32>
      %cst_23 = arith.constant 3.200000e+01 : f32
      %30 = vector.broadcast %cst_23 : f32 to vector<16x1xf32>
      %31 = arith.divf %29, %30 : vector<16x1xf32>
      %32 = vector.broadcast %24 : vector<16x1xf32> to vector<16x32xf32>
      %33 = arith.subf %18, %32 : vector<16x32xf32>
      %cst_24 = arith.constant 9.99999996E-13 : f32
      %34 = vector.broadcast %cst_24 : f32 to vector<16x1xf32>
      %35 = arith.addf %31, %34 : vector<16x1xf32>
      %36 = math.rsqrt %35 : vector<16x1xf32>
      %37 = vector.broadcast %36 : vector<16x1xf32> to vector<16x32xf32>
      %38 = arith.mulf %33, %37 : vector<16x32xf32>
      %39 = vector.broadcast %19 : vector<1x32xf32> to vector<16x32xf32>
      %40 = arith.mulf %38, %39 : vector<16x32xf32>
      %41 = vector.broadcast %20 : vector<1x32xf32> to vector<16x32xf32>
      %42 = arith.addf %40, %41 : vector<16x32xf32>
      %c0_25 = arith.constant 0 : index
      %c0_26 = arith.constant 0 : index
      %43 = vector.load %arg6[%c0_25, %c0_26] : memref<16x32xbf16, #tpu.memory_space<vmem>>, vector<16x32xbf16>
      %44 = arith.extf %43 : vector<16x32xbf16> to vector<16x32xf32>
      %45 = arith.addf %42, %44 : vector<16x32xf32>
      %c0_27 = arith.constant 0 : index
      %c0_28 = arith.constant 0 : index
      %46 = vector.load %arg9[%c0_27, %c0_28] : memref<16x32xf32, #tpu.memory_space<vmem>>, vector<16x32xf32>
      tpu.vector_store %arg9[%c0_27, %c0_28], %45 {strides = array<i32>} : memref<16x32xf32, #tpu.memory_space<vmem>>, vector<16x32xf32>,
    } else {
    }
    return
  }
  func.func @transform_0(%arg0: i32, %arg1: i32) -> (i32, i32) {
    %c0_i32 = arith.constant 0 : i32
    return %arg0, %arg1 : i32, i32
  }
  func.func @transform_1(%arg0: i32, %arg1: i32) -> (i32, i32) {
    %c0_i32 = arith.constant 0 : i32
    %c0_i32_0 = arith.constant 0 : i32
    return %arg1, %c0_i32 : i32, i32
  }
  func.func @transform_2(%arg0: i32, %arg1: i32) -> (i32, i32) {
    %c0_i32 = arith.constant 0 : i32
    %c0_i32_0 = arith.constant 0 : i32
    %c0_i32_1 = arith.constant 0 : i32
    return %c0_i32, %c0_i32_0 : i32, i32
  }
  func.func @transform_3(%arg0: i32, %arg1: i32) -> (i32, i32) {
    %c0_i32 = arith.constant 0 : i32
    %c0_i32_0 = arith.constant 0 : i32
    return %arg0, %c0_i32 : i32, i32
  }
  func.func @transform_4(%arg0: i32, %arg1: i32) -> (i32, i32) {
    %c0_i32 = arith.constant 0 : i32
    %c0_i32_0 = arith.constant 0 : i32
    return %arg0, %c0_i32 : i32, i32
  }
  func.func @transform_5(%arg0: i32, %arg1: i32) -> (i32, i32) {
    %c0_i32 = arith.constant 0 : i32
    %c0_i32_0 = arith.constant 0 : i32
    %c0_i32_1 = arith.constant 0 : i32
    return %c0_i32, %c0_i32_0 : i32, i32
  }
  func.func @transform_6(%arg0: i32, %arg1: i32) -> (i32, i32) {
    %c0_i32 = arith.constant 0 : i32
    %c0_i32_0 = arith.constant 0 : i32
    %c0_i32_1 = arith.constant 0 : i32
    return %c0_i32, %c0_i32_0 : i32, i32
  }
  func.func @transform_7(%arg0: i32, %arg1: i32) -> (i32, i32) {
    %c0_i32 = arith.constant 0 : i32
    %c0_i32_0 = arith.constant 0 : i32
    return %arg0, %c0_i32 : i32, i32
  }
}

</mosaic_0001>

<bundles_post_ra>
// kernel: bert_mid_layer_forward.12
= control target key start
LH: loop header
LB: loop body
LE: loop exit
PB: predicated region body
PF: predicated region fallthrough
CT: control target
= control target key end

     0   :  { %vm19_vm0 = vcmask 785408   ;;  %v108_v1 = vmov 0.0   ;;  %vm47_vm1 = vcmask 261120   ;;  %vm83_vm2 = vcmask 781312   ;;  %s151_s1 = inlined_call_operand.vmem [shape: bf16[32,96], index: 1, kind: input, shape index: {}]   ;;  %s152_s2 = inlined_call_operand.vmem [shape: f32[1,96], index: 2, kind: input, shape index: {}]   ;;  %s153_s0 = inlined_call_operand.vmem [shape: bf16[16,32], index: 0, kind: input, shape index: {}]   ;;  %s154_s3 = inlined_call_operand.vmem [shape: bf16[16,96], index: 3, kind: output, shape index: {}]  }
   0x1   :  { %v105_v0 = vld [vmem:[%s151_s1 + $0x8] sm:$0xff]  ;;  %20 = vst.msk [vmem:[#allocation2] sm:$0xff] %vm19_vm0, %v108_v1  ;;  %v104_v2 = vld [vmem:[%s151_s1] sm:$0xff] }
   0x2   :  { %21 = vst.msk [vmem:[#allocation2 + $0x8] sm:$0xff] %vm19_vm0, %v108_v1  ;;  %57 = vmatpush.bf16.msra.mxu0 %v105_v0  ;;  %v103_v3 = vld [vmem:[%s153_s0] sm:$0xff] }
   0x3   :  { %v107_v8 = vld [vmem:[%s152_s2] ss:$0 sm:$0xff] }
   0x6   :  { %58 = vmatpush.bf16.msra.mxu0 %v104_v2 }
   0x8   :  { %v22_v4 = vld [vmem:[#allocation2] sm:$0xff] }
   0x9   :  { %102 = vmatmul.msk.bf16.vlgmr.msra.gmra.mxu0 %vm47_vm1, %v103_v3  ;;  %v23_v7 = vld [vmem:[#allocation2 + $0x8] sm:$0xff] }
  0x86   :  { %v60_v5 = vpop.f32.mrf.mxu0 }
  0x87   :  { %v65_v6 = vadd.f32 %v60_v5, %v22_v4 }
  0x89   :  { %68 = vst.msk [vmem:[#allocation2] sm:$0xff] %vm19_vm0, %v65_v6 }
  0x8e   :  { %v62_v9 = vpop.f32.mrf.mxu0 }
  0x8f   :  { %v66_v10 = vadd.f32 %v62_v9, %v23_v7 }
  0x90   :  { %v73_v11 = vld [vmem:[#allocation2] sm:$0xff] }
  0x91   :  { %v79_v12 = vadd.f32 %v107_v8, %v73_v11  ;;  %69 = vst.msk [vmem:[#allocation2 + $0x8] sm:$0xff] %vm19_vm0, %v66_v10 }
  0x93   :  { %v81_v13 = vpack.c.bf16 %v79_v12, %v79_v12 }
  0x95   :  { %84 = vst.msk [vmem:[%s154_s3] sm:$0xf] %vm83_vm2, %v81_v13 }
  0x98   :  { %v74_v14 = vld [vmem:[#allocation2 + $0x8] sm:$0xff] }
  0x99   :  { %v80_v15 = vadd.f32 %v107_v8, %v74_v14 }
  0x9b   :  { %v82_v16 = vpack.c.bf16 %v80_v15, %v80_v15 }
  0x9d   :  { %85 = vst.msk [vmem:[%s154_s3 + $0x4] sm:$0xf] %vm83_vm2, %v82_v16 }

// kernel: bert_mid_layer_forward.11
= control target key start
LH: loop header
LB: loop body
LE: loop exit
PB: predicated region body
PF: predicated region fallthrough
CT: control target
= control target key end

     0   :  { %vm18_vm0 = vcmask 261120   ;;  %v98_v4 = vmov 32.0   ;;  %vm82_vm6 = vcmask 257024   ;;  %s141_s0 = inlined_call_operand.vmem [shape: f32[16,32], index: 0, kind: input, shape index: {}]   ;;  %s142_s1 = inlined_call_operand.vmem [shape: f32[1,32], index: 1, kind: input, shape index: {}]   ;;  %s143_s2 = inlined_call_operand.vmem [shape: f32[1,32], index: 2, kind: input, shape index: {}]   ;;  %s144_s3 = inlined_call_operand.vmem [shape: bf16[16,32], index: 3, kind: output, shape index: {}]  }
   0x1   :  { %v14_v0 = vld [vmem:[%s141_s0] sm:$0xff]  ;;  %v15_v2 = vld [vmem:[%s141_s0 + $0x8] sm:$0xff]  ;;  %92 = vrcp.f32 %v98_v4 }
   0x2   :  { %v19_v1 = vsel %vm18_vm0, %v14_v0, 0.0  ;;  %v22_v3 = vsel %vm18_vm0, %v15_v2, 0.0  ;;  %v90_v35 = vld [vmem:[%s142_s1] ss:$0 sm:$0xff] }
   0x3   :  { %20 = vadd.xlane.f32.xlu0 %v19_v1  ;;  %v91_v38 = vld [vmem:[%s143_s2] ss:$0 sm:$0xff] }
   0x7   :  { %v93_v5 = vpop.eup %92 }
   0x8   :  { %v26_v6 = vmul.f32 32.0, %v93_v5  ;;  %vm30_vm1 = vweird.f32 %v93_v5 }
   0xa   :  { %v27_v7 = vsub.f32 1.0, %v26_v6 }
   0xb   :  { %23 = vadd.xlane.f32.xlu0 %v22_v3 }
   0xc   :  { %v28_v8 = vmul.f32 %v93_v5, %v27_v7 }
   0xe   :  { %v29_v9 = vadd.f32 %v93_v5, %v28_v8 }
  0x10   :  { %v31_v10 = vsel %vm30_vm1, %v93_v5, %v29_v9 }
  0x76   :  { %v21_v11 = vpop.xlane.xlu0 %20 }
  0x77   :  { %v32_v12 = vmul.f32 %v31_v10, %v21_v11 }
  0x79   :  { %v34_v13 = vsub.f32 %v14_v0, %v32_v12 }
  0x7b   :  { %v36_v14 = vmul.f32 %v34_v13, %v34_v13 }
  0x7d   :  { %v38_v15 = vsel %vm18_vm0, %v36_v14, 0.0 }
  0x7e   :  { %39 = vadd.xlane.f32.xlu1 %v38_v15  ;;  %v24_v16 = vpop.xlane.xlu0 %23 }
  0x7f   :  { %v33_v17 = vmul.f32 %v31_v10, %v24_v16 }
  0x81   :  { %v35_v18 = vsub.f32 %v15_v2, %v33_v17 }
  0x83   :  { %v37_v19 = vmul.f32 %v35_v18, %v35_v18 }
  0x85   :  { %v41_v20 = vsel %vm18_vm0, %v37_v19, 0.0 }
  0x86   :  { %42 = vadd.xlane.f32.xlu1 %v41_v20 }
  0xf1   :  { %v40_v21 = vpop.xlane.xlu1 %39 }
  0xf2   :  { %v44_v22 = vmul.f32 %v40_v21, %v31_v10 }
  0xf4   :  { %v46_v23 = vadd.f32 1e-12, %v44_v22 }
  0xf6   :  { %94 = vrsqrt.f32 %v46_v23  ;;  %vm54_vm3 = vweird.f32 %v46_v23 }
  0xf9   :  { %v43_v24 = vpop.xlane.xlu1 %42 }
  0xfa   :  { %v45_v25 = vmul.f32 %v43_v24, %v31_v10 }
  0xfc   :  { %v95_v26 = vpop.eup %94  ;;  %v47_v27 = vadd.f32 1e-12, %v45_v25 }
  0xfd   :  { %v49_v28 = vmul.f32 %v95_v26, %v46_v23  ;;  %vm55_vm2 = vweird.f32 %v95_v26 }
  0xfe   :  { %96 = vrsqrt.f32 %v47_v27  ;;  %vm56_vm4 = vmor %vm54_vm3, %vm55_vm2  ;;  %vm64_vm7 = vweird.f32 %v47_v27 }
  0xff   :  { %v50_v29 = vmul.f32 %v95_v26, %v49_v28 }
 0x101   :  { %v51_v30 = vmul.f32 0.5, %v50_v29 }
 0x103   :  { %v52_v31 = vsub.f32 1.5, %v51_v30 }
 0x104   :  { %v97_v32 = vpop.eup %96 }
 0x105   :  { %v53_v33 = vmul.f32 %v95_v26, %v52_v31  ;;  %v59_v34 = vmul.f32 %v97_v32, %v47_v27  ;;  %vm65_vm5 = vweird.f32 %v97_v32 }
 0x106   :  { %vm66_vm8 = vmor %vm64_vm7, %vm65_vm5 }
 0x107   :  { %v57_v36 = vsel %vm56_vm4, %v95_v26, %v53_v33  ;;  %v60_v37 = vmul.f32 %v97_v32, %v59_v34 }
 0x108   :  { %v68_v39 = vmul.f32 %v57_v36, %v34_v13 }
 0x109   :  { %v61_v40 = vmul.f32 0.5, %v60_v37 }
 0x10a   :  { %v73_v41 = vmul.f32 %v90_v35, %v68_v39 }
 0x10b   :  { %v62_v42 = vsub.f32 1.5, %v61_v40 }
 0x10c   :  { %v78_v43 = vadd.f32 %v91_v38, %v73_v41 }
 0x10d   :  { %v63_v44 = vmul.f32 %v97_v32, %v62_v42 }
 0x10e   :  { %v80_v45 = vpack.c.bf16 %v78_v43, %v78_v43 }
 0x10f   :  { %v67_v46 = vsel %vm66_vm8, %v97_v32, %v63_v44 }
 0x110   :  { %83 = vst.msk [vmem:[%s144_s3] sm:$0xf] %vm82_vm6, %v80_v45  ;;  %v69_v47 = vmul.f32 %v67_v46, %v35_v18 }
 0x112   :  { %v74_v48 = vmul.f32 %v90_v35, %v69_v47 }
 0x114   :  { %v79_v49 = vadd.f32 %v91_v38, %v74_v48 }
 0x116   :  { %v81_v50 = vpack.c.bf16 %v79_v49, %v79_v49 }
 0x118   :  { %84 = vst.msk [vmem:[%s144_s3 + $0x4] sm:$0xf] %vm82_vm6, %v81_v50 }

// kernel: bert_mid_layer_forward.14
= control target key start
LH: loop header
LB: loop body
LE: loop exit
PB: predicated region body
PF: predicated region fallthrough
CT: control target
= control target key end

     0   :  { %vm28_vm0 = vcmask 261120   ;;  %v198_v1 = vmov 0.0   ;;  %v199_v22 = vmov 32.0   ;;  %vm160_vm6 = vcmask 257024   ;;  %s271_s1 = inlined_call_operand.vmem [shape: bf16[32,32], index: 1, kind: input, shape index: {}]   ;;  %s272_s0 = inlined_call_operand.vmem [shape: bf16[16,32], index: 0, kind: input, shape index: {}]   ;;  %s273_s2 = inlined_call_operand.vmem [shape: f32[1,32], index: 2, kind: input, shape index: {}]   ;;  %s274_s3 = inlined_call_operand.vmem [shape: bf16[16,32], index: 3, kind: input, shape index: {}]   ;;  %s275_s4 = inlined_call_operand.vmem [shape: f32[1,32], index: 4, kind: input, shape index: {}]   ;;  %s276_s5 = inlined_call_operand.vmem [shape: f32[1,32], index: 5, kind: input, shape index: {}]   ;;  %s277_s6 = inlined_call_operand.vmem [shape: bf16[16,32], index: 6, kind: output, shape index: {}]  }
   0x1   :  { %v182_v0 = vld [vmem:[%s271_s1 + $0x8] sm:$0xff]  ;;  %29 = vst.msk [vmem:[#allocation2] sm:$0xff] %vm28_vm0, %v198_v1  ;;  %v181_v2 = vld [vmem:[%s271_s1] sm:$0xff]  ;;  %192 = vrcp.f32 %v199_v22 }
   0x2   :  { %30 = vst.msk [vmem:[#allocation2 + $0x8] sm:$0xff] %vm28_vm0, %v198_v1  ;;  %66 = vmatpush.bf16.msra.mxu0 %v182_v0  ;;  %v180_v3 = vld [vmem:[%s272_s0] sm:$0xff] }
   0x3   :  { %v184_v8 = vld [vmem:[%s274_s3] sm:$0xff]  }
   0x4   :  { %v189_v9 = vld [vmem:[%s273_s2] ss:$0 sm:$0xff]  ;;  %v185_v12 = vunpack.c.l.bf16 %v184_v8  ;;  %v186_v17 = vunpack.c.h.bf16 %v184_v8 }
   0x5   :  { %v190_v53 = vld [vmem:[%s275_s4] ss:$0 sm:$0xff] }
   0x6   :  { %67 = vmatpush.bf16.msra.mxu0 %v181_v2  ;;  %v191_v56 = vld [vmem:[%s276_s5] ss:$0 sm:$0xff] }
   0x7   :  { %v193_v23 = vpop.eup %192 }
   0x8   :  { %v31_v4 = vld [vmem:[#allocation2] sm:$0xff]  ;;  %v104_v24 = vmul.f32 32.0, %v193_v23  ;;  %vm108_vm1 = vweird.f32 %v193_v23 }
   0x9   :  { %179 = vmatmul.msk.bf16.vlgmr.msra.gmra.mxu0 %vm28_vm0, %v180_v3  ;;  %v32_v7 = vld [vmem:[#allocation2 + $0x8] sm:$0xff] }
   0xa   :  { %v105_v25 = vsub.f32 1.0, %v104_v24 }
   0xc   :  { %v106_v26 = vmul.f32 %v193_v23, %v105_v25 }
   0xe   :  { %v107_v27 = vadd.f32 %v193_v23, %v106_v26 }
  0x10   :  { %v109_v28 = vsel %vm108_vm1, %v193_v23, %v107_v27 }
  0x86   :  { %v69_v5 = vpop.f32.mrf.mxu0 }
  0x87   :  { %v74_v6 = vadd.f32 %v69_v5, %v31_v4 }
  0x89   :  { %76 = vst.msk [vmem:[#allocation2] sm:$0xff] %vm28_vm0, %v74_v6 }
  0x8e   :  { %v71_v10 = vpop.f32.mrf.mxu0 }
  0x8f   :  { %v75_v11 = vadd.f32 %v71_v10, %v32_v7 }
  0x90   :  { %v81_v13 = vld [vmem:[#allocation2] sm:$0xff] }
  0x91   :  { %77 = vst.msk [vmem:[#allocation2 + $0x8] sm:$0xff] %vm28_vm0, %v75_v11  ;;  %v87_v14 = vadd.f32 %v189_v9, %v81_v13 }
  0x93   :  { %v93_v15 = vadd.f32 %v185_v12, %v87_v14 }
  0x95   :  { %v97_v16 = vsel %vm28_vm0, %v93_v15, 0.0 }
  0x96   :  { %98 = vadd.xlane.f32.xlu0 %v97_v16 }
  0x98   :  { %v82_v18 = vld [vmem:[#allocation2 + $0x8] sm:$0xff] }
  0x99   :  { %v88_v19 = vadd.f32 %v189_v9, %v82_v18 }
  0x9b   :  { %v94_v20 = vadd.f32 %v186_v17, %v88_v19 }
  0x9d   :  { %v100_v21 = vsel %vm28_vm0, %v94_v20, 0.0 }
  0x9e   :  { %101 = vadd.xlane.f32.xlu0 %v100_v21 }
 0x109   :  { %v99_v29 = vpop.xlane.xlu0 %98 }
 0x10a   :  { %v110_v30 = vmul.f32 %v109_v28, %v99_v29 }
 0x10c   :  { %v112_v31 = vsub.f32 %v93_v15, %v110_v30 }
 0x10e   :  { %v114_v32 = vmul.f32 %v112_v31, %v112_v31 }
 0x110   :  { %v116_v33 = vsel %vm28_vm0, %v114_v32, 0.0 }
 0x111   :  { %117 = vadd.xlane.f32.xlu1 %v116_v33  ;;  %v102_v34 = vpop.xlane.xlu0 %101 }
 0x112   :  { %v111_v35 = vmul.f32 %v109_v28, %v102_v34 }
 0x114   :  { %v113_v36 = vsub.f32 %v94_v20, %v111_v35 }
 0x116   :  { %v115_v37 = vmul.f32 %v113_v36, %v113_v36 }
 0x118   :  { %v119_v38 = vsel %vm28_vm0, %v115_v37, 0.0 }
 0x119   :  { %120 = vadd.xlane.f32.xlu1 %v119_v38 }
 0x184   :  { %v118_v39 = vpop.xlane.xlu1 %117 }
 0x185   :  { %v122_v40 = vmul.f32 %v118_v39, %v109_v28 }
 0x187   :  { %v124_v41 = vadd.f32 1e-12, %v122_v40 }
 0x189   :  { %194 = vrsqrt.f32 %v124_v41  ;;  %vm132_vm3 = vweird.f32 %v124_v41 }
 0x18c   :  { %v121_v42 = vpop.xlane.xlu1 %120 }
 0x18d   :  { %v123_v43 = vmul.f32 %v121_v42, %v109_v28 }
 0x18f   :  { %v195_v44 = vpop.eup %194  ;;  %v125_v45 = vadd.f32 1e-12, %v123_v43 }
 0x190   :  { %v127_v46 = vmul.f32 %v195_v44, %v124_v41  ;;  %vm133_vm2 = vweird.f32 %v195_v44 }
 0x191   :  { %196 = vrsqrt.f32 %v125_v45  ;;  %vm134_vm4 = vmor %vm132_vm3, %vm133_vm2  ;;  %vm142_vm7 = vweird.f32 %v125_v45 }
 0x192   :  { %v128_v47 = vmul.f32 %v195_v44, %v127_v46 }
 0x194   :  { %v129_v48 = vmul.f32 0.5, %v128_v47 }
 0x196   :  { %v130_v49 = vsub.f32 1.5, %v129_v48 }
 0x197   :  { %v197_v50 = vpop.eup %196 }
 0x198   :  { %v131_v51 = vmul.f32 %v195_v44, %v130_v49  ;;  %v137_v52 = vmul.f32 %v197_v50, %v125_v45  ;;  %vm143_vm5 = vweird.f32 %v197_v50 }
 0x199   :  { %vm144_vm8 = vmor %vm142_vm7, %vm143_vm5 }
 0x19a   :  { %v135_v54 = vsel %vm134_vm4, %v195_v44, %v131_v51  ;;  %v138_v55 = vmul.f32 %v197_v50, %v137_v52 }
 0x19b   :  { %v146_v57 = vmul.f32 %v135_v54, %v112_v31 }
 0x19c   :  { %v139_v58 = vmul.f32 0.5, %v138_v55 }
 0x19d   :  { %v151_v59 = vmul.f32 %v190_v53, %v146_v57 }
 0x19e   :  { %v140_v60 = vsub.f32 1.5, %v139_v58 }
 0x19f   :  { %v156_v61 = vadd.f32 %v191_v56, %v151_v59 }
 0x1a0   :  { %v141_v62 = vmul.f32 %v197_v50, %v140_v60 }
 0x1a1   :  { %v158_v63 = vpack.c.bf16 %v156_v61, %v156_v61 }
 0x1a2   :  { %v145_v0 = vsel %vm144_vm8, %v197_v50, %v141_v62 }
 0x1a3   :  { %161 = vst.msk [vmem:[%s277_s6] sm:$0xf] %vm160_vm6, %v158_v63  ;;  %v147_v1 = vmul.f32 %v145_v0, %v113_v36 }
 0x1a5   :  { %v152_v2 = vmul.f32 %v190_v53, %v147_v1 }
 0x1a7   :  { %v157_v3 = vadd.f32 %v191_v56, %v152_v2 }
 0x1a9   :  { %v159_v4 = vpack.c.bf16 %v157_v3, %v157_v3 }
 0x1ab   :  { %162 = vst.msk [vmem:[%s277_s6 + $0x4] sm:$0xf] %vm160_vm6, %v159_v4 }

// kernel: bert_mid_layer_forward.13
= control target key start
LH: loop header
LB: loop body
LE: loop exit
PB: predicated region body
PF: predicated region fallthrough
CT: control target
= control target key end

     0   :  { %s767_s12 = smov 0   ;;  %s769_s13 = smov 0   ;;  %s846_s0 = inlined_call_operand.vmem [shape: bf16[2,8,32], index: 0, kind: input, shape index: {}]   ;;  %s847_s1 = inlined_call_operand.vmem [shape: bf16[2,8,32], index: 1, kind: input, shape index: {}]   ;;  %s848_s2 = inlined_call_operand.vmem [shape: bf16[2,8,32], index: 2, kind: input, shape index: {}]   ;;  %s849_s3 = inlined_call_operand.vmem [shape: bf16[2,8,32], index: 3, kind: output, shape index: {}]  }
   0x1   :  { %s771_s14 = smov 0  }
   0x2 LB: > { %s32_s15 = sadd.s32 1, %s735_s13  ;;  %p656_p0 = scmp.ge.s32.totalorder %s739_s14, 1  ;;  %s739_s14 = sphi %s771_s14, %s13_s14   ;;  %s735_s13 = sphi %s769_s13, %s851_s13   ;;  %s731_s12 = sphi %s767_s12, %s850_s12  }
   0x3   : > { %p34_p1 = scmp.ge.s32.totalorder %s32_s15, 2  ;;  %p197_p2 = scmp.lt.s32.totalorder %s739_s14, 3 }
   0x5   : > { %s853_s15 = smov (%p34_p1, %s32_s15), 0  ;;  %p198_p3 = pnand %p656_p0, %p197_p2 }
   0x6   : > { %p245_p4 = scmp.lt.s32.totalorder (!%p198_p3), %s731_s12, 1  ;;  %s741_s23 = smov (!%p198_p3), 104  }
   0x7   : > { %201 = sbr.rel (%p198_p3) target bundleno = 826 (0x33a), region = 32  ;;  %s742_s24 = smov (!%p198_p3), 120  }
   0x8   : > { %s743_s25 = smov (!%p198_p3), 112   ;;  %s744_s29 = smov (!%p198_p3), 8  }
   0x9   : > { %s745_s30 = smov (!%p198_p3), 24   ;;  %s746_s4 = smov (!%p198_p3), 16  }
   0xc   : > { %s855_s12 = smov (!%p245_p4, %s731_s12), 1  ;;  %vm283_vm0 = vcmask 64512   ;;  %vm316_vm1 = vcmask 1043456   ;;  %vm525_vm2 = vcmask 130048   ;;  %vm527_vm3 = vcmask 195584  }
   0xd   : > { %s785_s16 = sshll.u32 %s855_s12, 2  ;;  %vm530_vm4 = vcmask 257024  }
   0xe   : > { %s261_s19 = scalar_lea.vmem %s847_s1, %s785_s16  ;;  %s254_s22 = scalar_lea.vmem %s846_s0, %s785_s16 }
   0xf   : > { %v281_v0 = vld [vmem:[%s261_s19] sm:$0xf]  ;;  %s268_s28 = scalar_lea.vmem %s848_s2, %s785_s16  ;;  %s278_s7 = scalar_lea.vmem %s849_s3, %s785_s16 }
  0x10   : > { %v288_v1 = vsel %vm283_vm0, %v281_v0, 0  ;;  %v341_v2 = vunpack.c.l.b16 %v281_v0  ;;  %v280_v3 = vld [vmem:[%s254_s22] sm:$0xf] }
  0x11   : > { %297 = vmatpush.bf16.xpose.msra.mxu0 %v288_v1  ;;  %v336_v4 = vunpack.c.l.b16 %v280_v3  ;;  %v282_v15 = vld [vmem:[%s268_s28] sm:$0xf] }
  0x12   : > { %v342_v5 = vpack.c.b16 %v341_v2, %v341_v2  ;;  %v318_v16 = vsel %vm316_vm1, %v282_v15, 0  ;;  %v375_v17 = vunpack.c.l.b16 %v282_v15 }
  0x13   : > { %v337_v6 = vpack.c.b16 %v336_v4, %v336_v4  ;;  %327 = vmatpush.bf16.msra.mxu1 %v318_v16 }
  0x14   : > { %458 = vrot.lane.b32.xlu2 %v342_v5, %s741_s23  ;;  %v376_v18 = vpack.c.b16 %v375_v17, %v375_v17 }
  0x15   : > { %338 = vrot.lane.b32.xlu1 %v337_v6, %s742_s24 }
  0x18   : > { %661 = vmatmul.msk.bf16.vlgmr.msra.gmra.mxu0 %vm283_vm0, %v280_v3 }
  0x1c   : > { %400 = vrot.lane.b32.xlu2 %v337_v6, %s743_s25 }
  0x1d   : > { %402 = vrot.lane.b32.xlu1 %v342_v5, %s743_s25 }
  0x25   : > { %456 = vrot.lane.b32.xlu1 %v337_v6, %s741_s23 }
  0x2d   : > { %377 = vrot.lane.b32.xlu1 %v376_v18, %s742_s24 }
  0x6e   : > { %v459_v8 = vpop.permute.xlu2 %458 }
  0x6f   : > { %v464_v9 = vsel %vm283_vm0, %v459_v8, 0 }
  0x70   : > { %473 = vmatpush.bf16.xpose.msrb.mxu0 %v464_v9 }
  0x76   : > { %v401_v30 = vpop.permute.xlu2 %400 }
  0x87   : > { %v339_v7 = vpop.permute.xlu1 %338 }
  0x8f   : > { %v403_v10 = vpop.permute.xlu1 %402 }
  0x90   : > { %v408_v19 = vsel %vm283_vm0, %v403_v10, 0 }
  0x91   : > { %417 = vmatpush.bf16.xpose.msrb.mxu1 %v408_v19 }
  0x95   : > { %v299_v11 = vpop.f32.mrf.mxu0 }
  0x96   : > { %v303_v12 = vsel %vm283_vm0, %v299_v11, -inf }
  0x97   : > { %304 = vmax.xlane.f32.xlu0 %v303_v12  ;;  %v457_v13 = vpop.permute.xlu1 %456 }
  0x98   : > { %667 = vmatmul.msk.bf16.vlgmr.msrb.gmra.mxu0 %vm283_vm0, %v457_v13 }
  0x9d   : > { %v301_v14 = vpop.f32.mrf.mxu0 }
  0x9f   : > { %v378_v40 = vpop.permute.xlu1 %377 }
  0xa0   : > { %v383_v41 = vsel %vm316_vm1, %v378_v40, 0 }
  0xa1   : > { %392 = vmatpush.bf16.msra.mxu3 %v383_v41 }
  0xab   : > { %343 = vrot.lane.b32.xlu0 %v342_v5, %s742_s24 }
 0x10a   : > { %v305_v20 = vpop.xlane.xlu0 %304 }
 0x10b   : > { %v306_v21 = vsub.f32 %v299_v11, %v305_v20 }
 0x10d   : > { %v307_v22 = vmul.f32 1.442695, %v306_v21 }
 0x10f   : > { %701 = vpow2.f32 %v307_v22 }
 0x115   : > { %v702_v23 = vpop.eup %701  ;;  %v475_v25 = vpop.f32.mrf.mxu0 }
 0x116   : > { %v312_v24 = vpack.c.bf16 %v702_v23, %v702_v23  ;;  %v479_v26 = vsel %vm283_vm0, %v475_v25, -inf  ;;  %v309_v39 = vsel %vm283_vm0, %v702_v23, 0.0 }
 0x117   : > { %480 = vmax.xlane.f32.xlu1 %v479_v26 }
 0x118   : > { %662 = vmatmul.msk.bf16.vlgmr.msra.gmra.mxu1 %vm283_vm0, %v312_v24 }
 0x11d   : > { %v344_v27 = vpop.permute.xlu0 %343  ;;  %v477_v29 = vpop.f32.mrf.mxu0 }
 0x11e   : > { %v349_v28 = vsel %vm283_vm0, %v344_v27, 0 }
 0x11f   : > { %358 = vmatpush.bf16.xpose.msra.mxu2 %v349_v28 }
 0x126   : > { %663 = vmatmul.msk.bf16.vlgmr.msra.gmra.mxu2 %vm283_vm0, %v339_v7 }
 0x128   : > { %665 = vmatmul.msk.bf16.vlgmr.msrb.gmra.mxu1 %vm283_vm0, %v401_v30 }
 0x18a   : > { %v481_v44 = vpop.xlane.xlu1 %480 }
 0x18b   : > { %v482_v47 = vsub.f32 %v475_v25, %v481_v44 }
 0x18d   : > { %v483_v50 = vmul.f32 1.442695, %v482_v47 }
 0x195   : > { %v815_v31 = vpop.f32.mrf.mxu1 }
 0x19d   : > { %v331_v32 = vpop.f32.mrf.mxu1 }
 0x1a5   : > { %v419_v33 = vpop.f32.mrf.mxu1 }
 0x1a6   : > { %v423_v34 = vsel %vm283_vm0, %v419_v33, -inf }
 0x1a7   : > { %424 = vmax.xlane.f32.xlu0 %v423_v34 }
 0x1a9   : > { %v360_v35 = vpop.f32.mrf.mxu2 }
 0x1aa   : > { %v364_v36 = vsel %vm283_vm0, %v360_v35, -inf }
 0x1ab   : > { %365 = vmax.xlane.f32.xlu2 %v364_v36 }
 0x1ad   : > { %v421_v37 = vpop.f32.mrf.mxu1 }
 0x1b1   : > { %v362_v38 = vpop.f32.mrf.mxu2 }
 0x1bb   : > { %489 = vrot.lane.b32.xlu0 %v376_v18, %s741_s23 }
 0x1c3   : > { %433 = vrot.lane.b32.xlu2 %v376_v18, %s743_s25 }
 0x1e5   : > { %310 = vadd.xlane.f32.xlu0 %v309_v39 }
 0x21a   : > { %v425_v42 = vpop.xlane.xlu0 %424 }
 0x21b   : > { %v426_v43 = vsub.f32 %v419_v33, %v425_v42 }
 0x21d   : > { %v427_v45 = vmul.f32 1.442695, %v426_v43 }
 0x21e   : > { %v366_v46 = vpop.xlane.xlu2 %365 }
 0x21f   : > { %703 = vpow2.f32 %v427_v45  ;;  %v367_v48 = vsub.f32 %v360_v35, %v366_v46 }
 0x221   : > { %v368_v49 = vmul.f32 1.442695, %v367_v48 }
 0x223   : > { %705 = vpow2.f32 %v368_v49 }
 0x224   : > { %707 = vpow2.f32 %v483_v50 }
 0x225   : > { %v704_v51 = vpop.eup %703 }
 0x226   : > { %v429_v52 = vsel %vm283_vm0, %v704_v51, 0.0  ;;  %v434_v53 = vpop.permute.xlu2 %433  ;;  %v432_v63 = vpack.c.bf16 %v704_v51, %v704_v51 }
 0x227   : > { %430 = vadd.xlane.f32.xlu2 %v429_v52  ;;  %v439_v54 = vsel %vm316_vm1, %v434_v53, 0 }
 0x228   : > { %448 = vmatpush.bf16.msrb.mxu3 %v439_v54 }
 0x229   : > { %v706_v55 = vpop.eup %705 }
 0x22a   : > { %v370_v56 = vsel %vm283_vm0, %v706_v55, 0.0  ;;  %v373_v57 = vpack.c.bf16 %v706_v55, %v706_v55  ;;  %v708_v58 = vpop.eup %707 }
 0x22b   : > { %371 = vadd.xlane.f32.xlu1 %v370_v56  ;;  %v488_v61 = vpack.c.bf16 %v708_v58, %v708_v58  ;;  %v485_v62 = vsel %vm283_vm0, %v708_v58, 0.0 }
 0x22c   : > { %664 = vmatmul.msk.bf16.vlgmr.msra.gmra.mxu3 %vm283_vm0, %v373_v57 }
 0x22d   : > { %v490_v59 = vpop.permute.xlu0 %489 }
 0x22e   : > { %v495_v60 = vsel %vm316_vm1, %v490_v59, 0 }
 0x22f   : > { %504 = vmatpush.bf16.msrb.mxu2 %v495_v60 }
 0x232   : > { %668 = vmatmul.msk.bf16.vlgmr.msrb.gmra.mxu2 %vm283_vm0, %v488_v61 }
 0x233   : > { %486 = vadd.xlane.f32.xlu1 %v485_v62 }
 0x23c   : > { %666 = vmatmul.msk.bf16.vlgmr.msrb.gmra.mxu3 %vm283_vm0, %v432_v63 }
 0x258   : > { %v311_v15 = vpop.xlane.xlu0 %310 }
 0x29a   : > { %v431_v7 = vpop.xlane.xlu2 %430 }
 0x29e   : > { %v372_v0 = vpop.xlane.xlu1 %371 }
 0x29f   : > { %709 = vrcp.f32 %v372_v0 }
 0x2a5   : > { %v710_v2 = vpop.eup %709 }
 0x2a6   : > { %v487_v1 = vpop.xlane.xlu1 %486 }
 0x2a7   : > { %711 = vrcp.f32 %v487_v1 }
 0x2a8   : > { %713 = vrcp.f32 %v431_v7 }
 0x2a9   : > { %715 = vrcp.f32 %v311_v15 }
 0x2ad   : > { %v712_v5 = vpop.eup %711 }
 0x2ae   : > { %v714_v11 = vpop.eup %713 }
 0x2af   : > { %v394_v3 = vpop.f32.mrf.mxu3  ;;  %v716_v17 = vpop.eup %715 }
 0x2b0   : > { %v399_v4 = vmul.f32 %v710_v2, %v394_v3  ;;  %v334_v18 = vmul.f32 %v716_v17, %v815_v31 }
 0x2b2   : > { %513 = vrot.lane.b32.xlu1 %v399_v4, %s744_s29 }
 0x2b5   : > { %v506_v6 = vpop.f32.mrf.mxu2 }
 0x2b6   : > { %v511_v8 = vmul.f32 %v712_v5, %v506_v6 }
 0x2b7   : > { %v396_v9 = vpop.f32.mrf.mxu3 }
 0x2b8   : > { %521 = vrot.lane.b32.xlu2 %v511_v8, %s745_s30 }
 0x2bd   : > { %v508_v10 = vpop.f32.mrf.mxu2 }
 0x2bf   : > { %v450_v12 = vpop.f32.mrf.mxu3 }
 0x2c0   : > { %v455_v13 = vmul.f32 %v714_v11, %v450_v12 }
 0x2c2   : > { %517 = vrot.lane.b32.xlu1 %v455_v13, %s746_s4 }
 0x2c7   : > { %v452_v14 = vpop.f32.mrf.mxu3 }
 0x312   : > { %v522_v21 = vpop.permute.xlu2 %521 }
 0x324   : > { %v514_v16 = vpop.permute.xlu1 %513 }
 0x325   : > { %v524_v19 = vsel %vm283_vm0, %v334_v18, %v514_v16 }
 0x334   : > { %v518_v20 = vpop.permute.xlu1 %517 }
 0x335   : > { %v526_v22 = vsel %vm525_vm2, %v524_v19, %v518_v20 }
 0x336   : > { %v528_v23 = vsel %vm527_vm3, %v526_v22, %v522_v21 }
 0x337   : > { %v529_v24 = vpack.c.bf16 %v528_v23, %v528_v23 }
 0x339   : > { %531 = vst.msk [vmem:[%s278_s7] sm:$0xf] %vm530_vm4, %v529_v24 }
 0x33a PF: > { %s13_s14 = sadd.s32 1, %s739_s14   ;;  %s850_s12 = smov %s735_s13 }
 0x33b   : > { %p10_p5 = scmp.ge.s32.totalorder %s13_s14, 4   ;;  %s851_s13 = smov %s853_s15 }
 0x33d   :  { %12 = sbr.rel (!%p10_p5) target bundleno = 2 (0x2), region = 68 }

// kernel: bert_mid_layer_forward.15
= control target key start
LH: loop header
LB: loop body
LE: loop exit
PB: predicated region body
PF: predicated region fallthrough
CT: control target
= control target key end

     0   :  { %vm19_vm0 = vcmask 523264   ;;  %v130_v1 = vmov 0.0   ;;  %vm47_vm1 = vcmask 261120   ;;  %vm101_vm2 = vcmask 519168   ;;  %s173_s1 = inlined_call_operand.vmem [shape: bf16[32,64], index: 1, kind: input, shape index: {}]   ;;  %s174_s2 = inlined_call_operand.vmem [shape: f32[1,64], index: 2, kind: input, shape index: {}]   ;;  %s175_s0 = inlined_call_operand.vmem [shape: bf16[16,32], index: 0, kind: input, shape index: {}]   ;;  %s176_s3 = inlined_call_operand.vmem [shape: bf16[16,64], index: 3, kind: output, shape index: {}]  }
   0x1   :  { %v123_v0 = vld [vmem:[%s173_s1 + $0x8] sm:$0xff]  ;;  %20 = vst.msk [vmem:[#allocation2] sm:$0xff] %vm19_vm0, %v130_v1  ;;  %v122_v2 = vld [vmem:[%s173_s1] sm:$0xff] }
   0x2   :  { %21 = vst.msk [vmem:[#allocation2 + $0x8] sm:$0xff] %vm19_vm0, %v130_v1  ;;  %57 = vmatpush.bf16.msra.mxu0 %v123_v0  ;;  %v121_v3 = vld [vmem:[%s175_s0] sm:$0xff] }
   0x3   :  { %v125_v8 = vld [vmem:[%s174_s2] ss:$0 sm:$0xff] }
   0x6   :  { %58 = vmatpush.bf16.msra.mxu0 %v122_v2 }
   0x8   :  { %v22_v4 = vld [vmem:[#allocation2] sm:$0xff] }
   0x9   :  { %120 = vmatmul.msk.bf16.vlgmr.msra.gmra.mxu0 %vm47_vm1, %v121_v3  ;;  %v23_v7 = vld [vmem:[#allocation2 + $0x8] sm:$0xff] }
  0x86   :  { %v60_v5 = vpop.f32.mrf.mxu0 }
  0x87   :  { %v65_v6 = vadd.f32 %v60_v5, %v22_v4 }
  0x89   :  { %68 = vst.msk [vmem:[#allocation2] sm:$0xff] %vm19_vm0, %v65_v6 }
  0x8e   :  { %v62_v9 = vpop.f32.mrf.mxu0 }
  0x8f   :  { %v66_v10 = vadd.f32 %v62_v9, %v23_v7 }
  0x90   :  { %v73_v11 = vld [vmem:[#allocation2] sm:$0xff] }
  0x91   :  { %v79_v12 = vadd.f32 %v125_v8, %v73_v11  ;;  %69 = vst.msk [vmem:[#allocation2 + $0x8] sm:$0xff] %vm19_vm0, %v66_v10 }
  0x93   :  { %v83_v13 = vmul.f32 0.044715, %v79_v12  ;;  %v81_v26 = vmul.f32 0.5, %v79_v12 }
  0x95   :  { %v85_v14 = vmul.f32 %v83_v13, %v79_v12 }
  0x97   :  { %v87_v15 = vmul.f32 %v85_v14, %v79_v12 }
  0x98   :  { %v74_v16 = vld [vmem:[#allocation2 + $0x8] sm:$0xff] }
  0x99   :  { %v89_v17 = vadd.f32 %v87_v15, %v79_v12  ;;  %v80_v18 = vadd.f32 %v125_v8, %v74_v16 }
  0x9b   :  { %v91_v19 = vmul.f32 0.7978846, %v89_v17  ;;  %v84_v20 = vmul.f32 0.044715, %v80_v18  ;;  %v82_v31 = vmul.f32 0.5, %v80_v18 }
  0x9d   :  { %126 = vtanh.f32 %v91_v19  ;;  %v86_v21 = vmul.f32 %v84_v20, %v80_v18 }
  0x9f   :  { %v88_v22 = vmul.f32 %v86_v21, %v80_v18 }
  0xa1   :  { %v90_v23 = vadd.f32 %v88_v22, %v80_v18 }
  0xa3   :  { %v127_v24 = vpop.eup %126  ;;  %v92_v25 = vmul.f32 0.7978846, %v90_v23 }
  0xa4   :  { %v95_v27 = vadd.f32 1.0, %v127_v24 }
  0xa5   :  { %128 = vtanh.f32 %v92_v25 }
  0xa6   :  { %v97_v28 = vmul.f32 %v95_v27, %v81_v26 }
  0xa8   :  { %v99_v29 = vpack.c.bf16 %v97_v28, %v97_v28 }
  0xaa   :  { %102 = vst.msk [vmem:[%s176_s3] sm:$0xf] %vm101_vm2, %v99_v29 }
  0xab   :  { %v129_v30 = vpop.eup %128 }
  0xac   :  { %v96_v32 = vadd.f32 1.0, %v129_v30 }
  0xae   :  { %v98_v33 = vmul.f32 %v96_v32, %v82_v31 }
  0xb0   :  { %v100_v34 = vpack.c.bf16 %v98_v33, %v98_v33 }
  0xb2   :  { %103 = vst.msk [vmem:[%s176_s3 + $0x4] sm:$0xf] %vm101_vm2, %v100_v34 }

// kernel: bert_mid_layer_forward.16
= control target key start
LH: loop header
LB: loop body
LE: loop exit
PB: predicated region body
PF: predicated region fallthrough
CT: control target
= control target key end

     0   :  { %vm28_vm0 = vcmask 261120   ;;  %v225_v1 = vmov 0.0   ;;  %vm72_vm1 = vcmask 523264   ;;  %v226_v24 = vmov 32.0   ;;  %s303_s1 = inlined_call_operand.vmem [shape: bf16[64,32], index: 1, kind: input, shape index: {}]   ;;  %s304_s0 = inlined_call_operand.vmem [shape: bf16[16,64], index: 0, kind: input, shape index: {}]   ;;  %s305_s2 = inlined_call_operand.vmem [shape: f32[1,32], index: 2, kind: input, shape index: {}]   ;;  %s306_s3 = inlined_call_operand.vmem [shape: bf16[16,32], index: 3, kind: input, shape index: {}]   ;;  %s307_s4 = inlined_call_operand.vmem [shape: f32[1,32], index: 4, kind: input, shape index: {}]   ;;  %s308_s5 = inlined_call_operand.vmem [shape: f32[1,32], index: 5, kind: input, shape index: {}]   ;;  %s309_s6 = inlined_call_operand.vmem [shape: bf16[16,32], index: 6, kind: output, shape index: {}]  }
   0x1   :  { %v209_v0 = vld [vmem:[%s303_s1 + $0x18] sm:$0xff]  ;;  %29 = vst.msk [vmem:[#allocation2] sm:$0xff] %vm28_vm0, %v225_v1  ;;  %v208_v2 = vld [vmem:[%s303_s1 + $0x10] sm:$0xff]  ;;  %v207_v3 = vld [vmem:[%s303_s1 + $0x8] sm:$0xff]  ;;  %219 = vrcp.f32 %v226_v24  ;;  %vm177_vm7 = vcmask 257024  }
   0x2   :  { %30 = vst.msk [vmem:[#allocation2 + $0x8] sm:$0xff] %vm28_vm0, %v225_v1  ;;  %80 = vmatpush.bf16.msra.mxu0 %v209_v0  ;;  %v206_v4 = vld [vmem:[%s303_s1] sm:$0xff] }
   0x3   :  { %v205_v5 = vld [vmem:[%s304_s0] sm:$0xff] }
   0x4   :  { %v211_v10 = vld [vmem:[%s306_s3] sm:$0xff]  }
   0x5   :  { %v216_v11 = vld [vmem:[%s305_s2] ss:$0 sm:$0xff]  ;;  %v212_v14 = vunpack.c.l.bf16 %v211_v10  ;;  %v213_v19 = vunpack.c.h.bf16 %v211_v10 }
   0x6   :  { %81 = vmatpush.bf16.msra.mxu0 %v208_v2  ;;  %v217_v55 = vld [vmem:[%s307_s4] ss:$0 sm:$0xff] }
   0x7   :  { %v220_v25 = vpop.eup %219  ;;  %v218_v58 = vld [vmem:[%s308_s5] ss:$0 sm:$0xff] }
   0x8   :  { %v31_v6 = vld [vmem:[#allocation2] sm:$0xff]  ;;  %v121_v26 = vmul.f32 32.0, %v220_v25  ;;  %vm125_vm2 = vweird.f32 %v220_v25 }
   0x9   :  { %v32_v9 = vld [vmem:[#allocation2 + $0x8] sm:$0xff] }
   0xa   :  { %82 = vmatpush.bf16.msra.mxu0 %v207_v3  ;;  %v122_v27 = vsub.f32 1.0, %v121_v26 }
   0xc   :  { %v123_v28 = vmul.f32 %v220_v25, %v122_v27 }
   0xe   :  { %83 = vmatpush.bf16.msra.mxu0 %v206_v4  ;;  %v124_v29 = vadd.f32 %v220_v25, %v123_v28 }
  0x10   :  { %v126_v30 = vsel %vm125_vm2, %v220_v25, %v124_v29 }
  0x11   :  { %204 = vmatmul.msk.bf16.vlgmr.msra.gmra.mxu0 %vm72_vm1, %v205_v5 }
  0x8e   :  { %v85_v7 = vpop.f32.mrf.mxu0 }
  0x8f   :  { %v90_v8 = vadd.f32 %v85_v7, %v31_v6 }
  0x91   :  { %93 = vst.msk [vmem:[#allocation2] sm:$0xff] %vm28_vm0, %v90_v8 }
  0x96   :  { %v87_v12 = vpop.f32.mrf.mxu0 }
  0x97   :  { %v91_v13 = vadd.f32 %v87_v12, %v32_v9 }
  0x98   :  { %v98_v15 = vld [vmem:[#allocation2] sm:$0xff] }
  0x99   :  { %94 = vst.msk [vmem:[#allocation2 + $0x8] sm:$0xff] %vm28_vm0, %v91_v13  ;;  %v104_v16 = vadd.f32 %v216_v11, %v98_v15 }
  0x9b   :  { %v110_v17 = vadd.f32 %v212_v14, %v104_v16 }
  0x9d   :  { %v114_v18 = vsel %vm28_vm0, %v110_v17, 0.0 }
  0x9e   :  { %115 = vadd.xlane.f32.xlu0 %v114_v18 }
  0xa0   :  { %v99_v20 = vld [vmem:[#allocation2 + $0x8] sm:$0xff] }
  0xa1   :  { %v105_v21 = vadd.f32 %v216_v11, %v99_v20 }
  0xa3   :  { %v111_v22 = vadd.f32 %v213_v19, %v105_v21 }
  0xa5   :  { %v117_v23 = vsel %vm28_vm0, %v111_v22, 0.0 }
  0xa6   :  { %118 = vadd.xlane.f32.xlu0 %v117_v23 }
 0x111   :  { %v116_v31 = vpop.xlane.xlu0 %115 }
 0x112   :  { %v127_v32 = vmul.f32 %v126_v30, %v116_v31 }
 0x114   :  { %v129_v33 = vsub.f32 %v110_v17, %v127_v32 }
 0x116   :  { %v131_v34 = vmul.f32 %v129_v33, %v129_v33 }
 0x118   :  { %v133_v35 = vsel %vm28_vm0, %v131_v34, 0.0 }
 0x119   :  { %134 = vadd.xlane.f32.xlu1 %v133_v35  ;;  %v119_v36 = vpop.xlane.xlu0 %118 }
 0x11a   :  { %v128_v37 = vmul.f32 %v126_v30, %v119_v36 }
 0x11c   :  { %v130_v38 = vsub.f32 %v111_v22, %v128_v37 }
 0x11e   :  { %v132_v39 = vmul.f32 %v130_v38, %v130_v38 }
 0x120   :  { %v136_v40 = vsel %vm28_vm0, %v132_v39, 0.0 }
 0x121   :  { %137 = vadd.xlane.f32.xlu1 %v136_v40 }
 0x18c   :  { %v135_v41 = vpop.xlane.xlu1 %134 }
 0x18d   :  { %v139_v42 = vmul.f32 %v135_v41, %v126_v30 }
 0x18f   :  { %v141_v43 = vadd.f32 1e-12, %v139_v42 }
 0x191   :  { %221 = vrsqrt.f32 %v141_v43  ;;  %vm149_vm4 = vweird.f32 %v141_v43 }
 0x194   :  { %v138_v44 = vpop.xlane.xlu1 %137 }
 0x195   :  { %v140_v45 = vmul.f32 %v138_v44, %v126_v30 }
 0x197   :  { %v222_v46 = vpop.eup %221  ;;  %v142_v47 = vadd.f32 1e-12, %v140_v45 }
 0x198   :  { %v144_v48 = vmul.f32 %v222_v46, %v141_v43  ;;  %vm150_vm3 = vweird.f32 %v222_v46 }
 0x199   :  { %223 = vrsqrt.f32 %v142_v47  ;;  %vm151_vm5 = vmor %vm149_vm4, %vm150_vm3  ;;  %vm159_vm8 = vweird.f32 %v142_v47 }
 0x19a   :  { %v145_v49 = vmul.f32 %v222_v46, %v144_v48 }
 0x19c   :  { %v146_v50 = vmul.f32 0.5, %v145_v49 }
 0x19e   :  { %v147_v51 = vsub.f32 1.5, %v146_v50 }
 0x19f   :  { %v224_v52 = vpop.eup %223 }
 0x1a0   :  { %v148_v53 = vmul.f32 %v222_v46, %v147_v51  ;;  %v154_v54 = vmul.f32 %v224_v52, %v142_v47  ;;  %vm160_vm6 = vweird.f32 %v224_v52 }
 0x1a1   :  { %vm161_vm9 = vmor %vm159_vm8, %vm160_vm6 }
 0x1a2   :  { %v152_v56 = vsel %vm151_vm5, %v222_v46, %v148_v53  ;;  %v155_v57 = vmul.f32 %v224_v52, %v154_v54 }
 0x1a3   :  { %v163_v59 = vmul.f32 %v152_v56, %v129_v33 }
 0x1a4   :  { %v156_v60 = vmul.f32 0.5, %v155_v57 }
 0x1a5   :  { %v168_v61 = vmul.f32 %v217_v55, %v163_v59 }
 0x1a6   :  { %v157_v62 = vsub.f32 1.5, %v156_v60 }
 0x1a7   :  { %v173_v63 = vadd.f32 %v218_v58, %v168_v61 }
 0x1a8   :  { %v158_v0 = vmul.f32 %v224_v52, %v157_v62 }
 0x1a9   :  { %v175_v1 = vpack.c.bf16 %v173_v63, %v173_v63 }
 0x1aa   :  { %v162_v2 = vsel %vm161_vm9, %v224_v52, %v158_v0 }
 0x1ab   :  { %178 = vst.msk [vmem:[%s309_s6] sm:$0xf] %vm177_vm7, %v175_v1  ;;  %v164_v3 = vmul.f32 %v162_v2, %v130_v38 }
 0x1ad   :  { %v169_v4 = vmul.f32 %v217_v55, %v164_v3 }
 0x1af   :  { %v174_v5 = vadd.f32 %v218_v58, %v169_v4 }
 0x1b1   :  { %v176_v6 = vpack.c.bf16 %v174_v5, %v174_v5 }
 0x1b3   :  { %179 = vst.msk [vmem:[%s309_s6 + $0x4] sm:$0xf] %vm177_vm7, %v176_v6 }

// kernel: bert_mid_layer_forward.21
= control target key start
LH: loop header
LB: loop body
LE: loop exit
PB: predicated region body
PF: predicated region fallthrough
CT: control target
= control target key end

     0   :  { %vm32_vm0 = vcmask 261120   ;;  %v279_v1 = vmov 0.0   ;;  %s367_s0 = inlined_call_operand.vmem [shape: bf16[16,64], index: 0, kind: input, shape index: {}]   ;;  %s368_s1 = inlined_call_operand.vmem [shape: bf16[64,32], index: 1, kind: input, shape index: {}]   ;;  %s369_s2 = inlined_call_operand.vmem [shape: f32[1,32], index: 2, kind: input, shape index: {}]   ;;  %s370_s3 = inlined_call_operand.vmem [shape: bf16[16,32], index: 3, kind: input, shape index: {}]   ;;  %s371_s4 = inlined_call_operand.vmem [shape: bf16[16,32], index: 4, kind: input, shape index: {}]   ;;  %s372_s5 = inlined_call_operand.vmem [shape: f32[1,32], index: 5, kind: input, shape index: {}]   ;;  %s373_s6 = inlined_call_operand.vmem [shape: f32[1,32], index: 6, kind: input, shape index: {}]   ;;  %s374_s7 = inlined_call_operand.hbm [shape: f32[16,32], index: 7, kind: output, shape index: {}]  }
   0x1   :  { %v230_v0 = vld [vmem:[%s368_s1 + $0x18] sm:$0xff]  ;;  %33 = vst.msk [vmem:[#allocation2] sm:$0xff] %vm32_vm0, %v279_v1  ;;  %v229_v2 = vld [vmem:[%s368_s1 + $0x10] sm:$0xff] }
   0x2   :  { %84 = vmatpush.bf16.msra.mxu0 %v230_v0  ;;  %34 = vst.msk [vmem:[#allocation2 + $0x8] sm:$0xff] %vm32_vm0, %v279_v1 }
   0x3   :  { %12 = vsyncpa [#allocation4], 0  ;;  %v228_v3 = vld [vmem:[%s368_s1 + $0x8] sm:$0xff]  ;;  %v227_v4 = vld [vmem:[%s368_s1] sm:$0xff]  ;;  %vm76_vm1 = vcmask 523264   ;;  %v280_v24 = vmov 32.0  }
   0x4   :  { %v226_v5 = vld [vmem:[%s367_s0] sm:$0xff]  ;;  %247 = vrcp.f32 %v280_v24  ;;  %s193_s18 = sshll.u32 %s374_s7, 4  ;;  %s282_s19 = smov 128   ;;  %s194_s18 = int_to_ptr.hbm [resolvable:$true] %s193_s18 }
   0x5   :  { %v232_v10 = vld [vmem:[%s370_s3] sm:$0xff]   ;;  %s283_s20 = smov 8  }
   0x6   :  { %85 = vmatpush.bf16.msra.mxu0 %v229_v2  ;;  %v244_v11 = vld [vmem:[%s369_s2] ss:$0 sm:$0xff]  ;;  %v233_v14 = vunpack.c.l.bf16 %v232_v10  ;;  %v234_v19 = vunpack.c.h.bf16 %v232_v10 }
   0x7   :  { %v245_v55 = vld [vmem:[%s372_s5] ss:$0 sm:$0xff] }
   0x8   :  { %v35_v6 = vld [vmem:[#allocation2] sm:$0xff] }
   0x9   :  { %v36_v9 = vld [vmem:[#allocation2 + $0x8] sm:$0xff]  ;;  %v236_v58 = vld [vmem:[%s371_s4] sm:$0xff]   ;;  %s281_s4 = smov [#allocation3]  }
   0xa   :  { %86 = vmatpush.bf16.msra.mxu0 %v228_v3  ;;  %v248_v25 = vpop.eup %247  ;;  %v246_v59 = vld [vmem:[%s373_s6] ss:$0 sm:$0xff]  ;;  %v237_v63 = vunpack.c.l.bf16 %v236_v58  ;;  %s191_s5 = sshll.u32 %s281_s4, 4  ;;  %s192_s5 = int_to_ptr.vmem [resolvable:$true] %s191_s5 }
   0xb   :  { %v125_v26 = vmul.f32 32.0, %v248_v25  ;;  %vm129_vm2 = vweird.f32 %v248_v25 }
   0xd   :  { %v126_v27 = vsub.f32 1.0, %v125_v26 }
   0xe   :  { %87 = vmatpush.bf16.msra.mxu0 %v227_v4 }
   0xf   :  { %v127_v28 = vmul.f32 %v248_v25, %v126_v27 }
  0x11   :  { %225 = vmatmul.msk.bf16.vlgmr.msra.gmra.mxu0 %vm76_vm1, %v226_v5  ;;  %v128_v29 = vadd.f32 %v248_v25, %v127_v28 }
  0x13   :  { %v130_v30 = vsel %vm129_vm2, %v248_v25, %v128_v29 }
  0x8e   :  { %v89_v7 = vpop.f32.mrf.mxu0 }
  0x8f   :  { %v94_v8 = vadd.f32 %v89_v7, %v35_v6  ;;  %v238_v7 = vunpack.c.h.bf16 %v236_v58 }
  0x91   :  { %97 = vst.msk [vmem:[#allocation2] sm:$0xff] %vm32_vm0, %v94_v8 }
  0x96   :  { %v91_v12 = vpop.f32.mrf.mxu0 }
  0x97   :  { %v95_v13 = vadd.f32 %v91_v12, %v36_v9 }
  0x98   :  { %v102_v15 = vld [vmem:[#allocation2] sm:$0xff] }
  0x99   :  { %98 = vst.msk [vmem:[#allocation2 + $0x8] sm:$0xff] %vm32_vm0, %v95_v13  ;;  %v108_v16 = vadd.f32 %v244_v11, %v102_v15 }
  0x9b   :  { %v114_v17 = vadd.f32 %v233_v14, %v108_v16 }
  0x9d   :  { %v118_v18 = vsel %vm32_vm0, %v114_v17, 0.0 }
  0x9e   :  { %119 = vadd.xlane.f32.xlu0 %v118_v18 }
  0xa0   :  { %v103_v20 = vld [vmem:[#allocation2 + $0x8] sm:$0xff] }
  0xa1   :  { %v109_v21 = vadd.f32 %v244_v11, %v103_v20 }
  0xa3   :  { %v115_v22 = vadd.f32 %v234_v19, %v109_v21 }
  0xa5   :  { %v121_v23 = vsel %vm32_vm0, %v115_v22, 0.0 }
  0xa6   :  { %122 = vadd.xlane.f32.xlu0 %v121_v23 }
 0x111   :  { %v120_v31 = vpop.xlane.xlu0 %119 }
 0x112   :  { %v131_v32 = vmul.f32 %v130_v30, %v120_v31 }
 0x114   :  { %v133_v33 = vsub.f32 %v114_v17, %v131_v32 }
 0x116   :  { %v135_v34 = vmul.f32 %v133_v33, %v133_v33 }
 0x118   :  { %v137_v35 = vsel %vm32_vm0, %v135_v34, 0.0 }
 0x119   :  { %138 = vadd.xlane.f32.xlu1 %v137_v35  ;;  %v123_v36 = vpop.xlane.xlu0 %122 }
 0x11a   :  { %v132_v37 = vmul.f32 %v130_v30, %v123_v36 }
 0x11c   :  { %v134_v38 = vsub.f32 %v115_v22, %v132_v37 }
 0x11e   :  { %v136_v39 = vmul.f32 %v134_v38, %v134_v38 }
 0x120   :  { %v140_v40 = vsel %vm32_vm0, %v136_v39, 0.0 }
 0x121   :  { %141 = vadd.xlane.f32.xlu1 %v140_v40 }
 0x18c   :  { %v139_v41 = vpop.xlane.xlu1 %138 }
 0x18d   :  { %v143_v42 = vmul.f32 %v139_v41, %v130_v30 }
 0x18f   :  { %v145_v43 = vadd.f32 1e-12, %v143_v42 }
 0x191   :  { %249 = vrsqrt.f32 %v145_v43  ;;  %vm153_vm4 = vweird.f32 %v145_v43 }
 0x194   :  { %v142_v44 = vpop.xlane.xlu1 %141 }
 0x195   :  { %v144_v45 = vmul.f32 %v142_v44, %v130_v30 }
 0x197   :  { %v250_v46 = vpop.eup %249  ;;  %v146_v47 = vadd.f32 1e-12, %v144_v45 }
 0x198   :  { %v148_v48 = vmul.f32 %v250_v46, %v145_v43  ;;  %vm154_vm3 = vweird.f32 %v250_v46 }
 0x199   :  { %251 = vrsqrt.f32 %v146_v47  ;;  %vm155_vm5 = vmor %vm153_vm4, %vm154_vm3  ;;  %vm163_vm7 = vweird.f32 %v146_v47 }
 0x19a   :  { %v149_v49 = vmul.f32 %v250_v46, %v148_v48 }
 0x19c   :  { %v150_v50 = vmul.f32 0.5, %v149_v49 }
 0x19e   :  { %v151_v51 = vsub.f32 1.5, %v150_v50 }
 0x19f   :  { %v252_v52 = vpop.eup %251 }
 0x1a0   :  { %v152_v53 = vmul.f32 %v250_v46, %v151_v51  ;;  %v158_v54 = vmul.f32 %v252_v52, %v146_v47  ;;  %vm164_vm6 = vweird.f32 %v252_v52 }
 0x1a1   :  { %vm165_vm8 = vmor %vm163_vm7, %vm164_vm6 }
 0x1a2   :  { %v156_v56 = vsel %vm155_vm5, %v250_v46, %v152_v53  ;;  %v159_v57 = vmul.f32 %v252_v52, %v158_v54 }
 0x1a3   :  { %v167_v60 = vmul.f32 %v156_v56, %v133_v33 }
 0x1a4   :  { %v160_v61 = vmul.f32 0.5, %v159_v57 }
 0x1a5   :  { %v172_v62 = vmul.f32 %v245_v55, %v167_v60 }
 0x1a6   :  { %v161_v0 = vsub.f32 1.5, %v160_v61 }
 0x1a7   :  { %v177_v1 = vadd.f32 %v246_v59, %v172_v62 }
 0x1a8   :  { %v162_v2 = vmul.f32 %v252_v52, %v161_v0 }
 0x1a9   :  { %v183_v3 = vadd.f32 %v237_v63, %v177_v1 }
 0x1aa   :  { %v166_v4 = vsel %vm165_vm8, %v252_v52, %v162_v2 }
 0x1ab   :  { %v168_v5 = vmul.f32 %v166_v4, %v134_v38  ;;  %185 = vst.msk [vmem:[#allocation3] sm:$0xff] %vm32_vm0, %v183_v3 }
 0x1ad   :  { %v173_v6 = vmul.f32 %v245_v55, %v168_v5 }
 0x1af   :  { %v178_v8 = vadd.f32 %v246_v59, %v173_v6 }
 0x1b1   :  { %v184_v9 = vadd.f32 %v238_v7, %v178_v8 }
 0x1b3   :  { %186 = vst.msk [vmem:[#allocation3 + $0x8] sm:$0xff] %vm32_vm0, %v184_v9 }
 0x1b4   :  { %199 = dma.vmem_to_hbm [thread:$0]  %s192_s5, 256, %s194_s18, [#allocation4], %s282_s19, %s282_s19, %s283_s20  }
 0x1b5   :  { %277 = dma.done.wait [#allocation4], 256  }
 0x1b6   :  { %278 = vsyncadd [#allocation4], 4294967040 }
 0x1b7   :  { %204 = vsyncpa [#allocation4], 1 }

</bundles_post_ra>
